<compile_context>
chip_gen: v7x
topology: tpu7x:2x2x1
jax: 0.10.0
libtpu: 0.0.40
codegen_flags: <defaults>
</compile_context>

<pallas_src>
import functools
import math

import jax
import jax.numpy as jnp
from jax.experimental import pallas as pl
from jax.experimental.pallas import tpu as pltpu


# ----------------------------------------------------------------------------
# Fused encoder kernel (no grid: single invocation, everything resident in VMEM)
# ----------------------------------------------------------------------------
def _encoder_kernel(x_ref, *args, T, B, H, L):
    """args = (wx_0, wh_0, b_0, ..., wx_{L-1}, wh_{L-1}, b_{L-1}, out_ref, y_ref).

    Per-layer fused weights:
      wx_l : (Din_l, 16H)  input projection, columns = [same-index block | reversed-index block]
      wh_l : (2H, 8H)      recurrent projection, block-diagonal over {fwd, rev}
      b_l  : (1, 8H)       b_ih + b_hh, gate-interleaved [i_f,i_r,f_f,f_r,g_f,g_r,o_f,o_r]
    """
    weight_refs = args[: 3 * L]
    out_ref = args[3 * L]
    y_ref = args[3 * L + 1]            # (T, B, 2H) VMEM scratch: current layer's output seq

    G = 8 * H                          # fused gate width (4 gates x 2 directions)
    hidden_acc = jnp.zeros((B, H), jnp.float32)

    for layer in range(L):
        wx_ref, wh_ref, b_ref = weight_refs[3 * layer: 3 * layer + 3]
        wh = wh_ref[...]               # (2H, 8H) -- hoisted, loop-invariant
        b = b_ref[...]                 # (1, 8H)

        # ---- hoisted input projection: one big matmul for all timesteps ------
        z = x_ref[...] if layer == 0 else y_ref[...]          # (T, B, Din)
        din = z.shape[-1]
        g_all = jnp.dot(
            z.reshape(T * B, din), wx_ref[...],
            preferred_element_type=jnp.float32,
        ).reshape(T, B, 2 * G)
        g_same = g_all[..., :G]        # contribution indexed by t
        g_swap = g_all[..., G:]        # contribution indexed by T-1-t

        # Combine same-index / reversed-index contributions and bias BEFORE the
        # recurrence: nothing h-independent remains inside the serial loop.
        g_pre = [g_same[t] + g_swap[T - 1 - t] + b for t in range(T)]   # each (B, 8H)

        # ---- serial recurrence (fully unrolled, states live in vregs) --------
        h = jnp.zeros((B, 2 * H), jnp.float32)   # [h_fwd | h_rev]
        c = jnp.zeros((B, 2 * H), jnp.float32)   # [c_fwd | c_rev]
        for t in range(T):
            gates = g_pre[t] + jnp.dot(h, wh, preferred_element_type=jnp.float32)  # (B, 8H)
            # i and f are adjacent -> one lane-aligned sigmoid covers both.
            s_if = jax.nn.sigmoid(gates[:, : 4 * H])
            i_g = s_if[:, : 2 * H]
            f_g = s_if[:, 2 * H:]
            g_g = jnp.tanh(gates[:, 4 * H: 6 * H])
            o_g = jax.nn.sigmoid(gates[:, 6 * H:])
            c = f_g * c + i_g * g_g
            h = o_g * jnp.tanh(c)
            if layer < L - 1:
                y_ref[t] = h           # next layer's input sequence (stays in VMEM)

        # final hidden states of both directions of this layer
        hidden_acc = hidden_acc + h[:, :H] + h[:, H:]

    out_ref[0] = hidden_acc            # single HBM write at the end


def encoder_forward(x, fused_params, hidden_size, num_layers):
    """x: (T, B, input_size) -> (1, B, hidden_size). fused_params: [(wx, wh, b), ...]."""
    T, B, _ = x.shape
    H = hidden_size
    kernel = functools.partial(_encoder_kernel, T=T, B=B, H=H, L=num_layers)

    inputs = [x]
    for (wx, wh, b) in fused_params:
        inputs += [wx, wh, b]
    vmem_spec = pl.BlockSpec(memory_space=pltpu.MemorySpace.VMEM)

    return pl.pallas_call(
        kernel,
        out_shape=jax.ShapeDtypeStruct((1, B, H), jnp.float32),
        in_specs=[vmem_spec] * len(inputs),
        out_specs=vmem_spec,
        scratch_shapes=[pltpu.VMEM((T, B, 2 * H), jnp.float32)],
    )(*inputs)


# ----------------------------------------------------------------------------
# Parameter init (nn.LSTM shapes, uniform(-1/sqrt(H), 1/sqrt(H)))
# ----------------------------------------------------------------------------
def init_encoder_params(key, input_size, hidden_size, num_layers):
    H = hidden_size
    bound = 1.0 / math.sqrt(H)
    params = []
    for layer in range(num_layers):
        din = input_size if layer == 0 else 2 * H
        layer_p = {}
        for direction in ("fwd", "rev"):
            key, k1, k2, k3, k4 = jax.random.split(key, 5)
            layer_p[direction] = {
                "w_ih": jax.random.uniform(k1, (4 * H, din), jnp.float32, -bound, bound),
                "w_hh": jax.random.uniform(k2, (4 * H, H), jnp.float32, -bound, bound),
                "b_ih": jax.random.uniform(k3, (4 * H,), jnp.float32, -bound, bound),
                "b_hh": jax.random.uniform(k4, (4 * H,), jnp.float32, -bound, bound),
            }
        params.append(layer_p)
    return params


def build_fused_params(raw_params, hidden_size):
    """Build the fused/interleaved weight layout consumed by the kernel."""
    H = hidden_size
    G = 8 * H

    def place(dst, row0, w_t, direction):
        # w_t: (rows, 4H), PyTorch gate order i,f,g,o along last dim.
        # gate k -> interleaved column block [k*2H + direction*H, +H)
        rows = w_t.shape[0]
        for k in range(4):
            col = k * 2 * H + direction * H
            dst = dst.at[row0:row0 + rows, col:col + H].set(w_t[:, k * H:(k + 1) * H])
        return dst

    fused = []
    for layer_idx, lp in enumerate(raw_params):
        f, r = lp["fwd"], lp["rev"]
        din = f["w_ih"].shape[1]

        # recurrent weights: rows [0:H]=h_fwd -> fwd gate cols, rows [H:2H]=h_rev -> rev cols
        wh = jnp.zeros((2 * H, G), jnp.float32)
        wh = place(wh, 0, f["w_hh"].T, 0)
        wh = place(wh, H, r["w_hh"].T, 1)

        # bias (b_ih + b_hh), gate-interleaved
        b = jnp.zeros((G,), jnp.float32)
        bf = f["b_ih"] + f["b_hh"]
        br = r["b_ih"] + r["b_hh"]
        for k in range(4):
            b = b.at[k * 2 * H: k * 2 * H + H].set(bf[k * H:(k + 1) * H])
            b = b.at[k * 2 * H + H: (k + 1) * 2 * H].set(br[k * H:(k + 1) * H])
        b = b[None, :]

        # input projection: [same-index block | reversed-index block] -> (Din, 16H)
        wa = jnp.zeros((din, G), jnp.float32)
        wb = jnp.zeros((din, G), jnp.float32)
        if layer_idx == 0:
            wa = place(wa, 0, f["w_ih"].T, 0)           # x[t]        -> fwd gates
            wb = place(wb, 0, r["w_ih"].T, 1)           # x[T-1-t]    -> rev gates
        else:
            # previous-layer sequence stored as Y[t] = [h_fwd(t) | h_rev(rev-step t)]
            wa = place(wa, 0, f["w_ih"][:, :H].T, 0)    # y_fwd[t]      -> fwd gates
            wa = place(wa, H, r["w_ih"][:, H:].T, 1)    # y_rev[t]      -> rev gates
            wb = place(wb, H, f["w_ih"][:, H:].T, 0)    # y_rev[T-1-t]  -> fwd gates
            wb = place(wb, 0, r["w_ih"][:, :H].T, 1)    # y_fwd[T-1-t]  -> rev gates
        wx = jnp.concatenate([wa, wb], axis=1)

        fused.append((wx, wh, b))
    return fused


# ----------------------------------------------------------------------------
# Pure-JAX reference (same math, lax.scan) to validate the fused kernel.
# ----------------------------------------------------------------------------
def _ref_lstm_direction(x, w_ih, w_hh, b_ih, b_hh, H):
    B = x.shape[1]
    w_ih_t, w_hh_t, b = w_ih.T, w_hh.T, (b_ih + b_hh)[None, :]

    def step(carry, x_t):
        h, c = carry
        gates = x_t @ w_ih_t + h @ w_hh_t + b
        i = jax.nn.sigmoid(gates[:, 0 * H:1 * H])
        f = jax.nn.sigmoid(gates[:, 1 * H:2 * H])
        g = jnp.tanh(gates[:, 2 * H:3 * H])
        o = jax.nn.sigmoid(gates[:, 3 * H:4 * H])
        c = f * c + i * g
        h = o * jnp.tanh(c)
        return (h, c), h

    init = (jnp.zeros((B, H), jnp.float32), jnp.zeros((B, H), jnp.float32))
    _, ys = jax.lax.scan(step, init, x)
    return ys


def encoder_forward_ref(x, raw_params, H):
    layer_in = x
    h_n = []
    for lp in raw_params:
        f, r = lp["fwd"], lp["rev"]
        y_f = _ref_lstm_direction(layer_in, f["w_ih"], f["w_hh"], f["b_ih"], f["b_hh"], H)
        y_r = _ref_lstm_direction(layer_in[::-1], r["w_ih"], r["w_hh"], r["b_ih"], r["b_hh"], H)
        h_n.append(y_f[-1])
        h_n.append(y_r[-1])
        layer_in = jnp.concatenate([y_f, y_r[::-1]], axis=-1)
    return jnp.sum(jnp.stack(h_n, axis=0), axis=0, keepdims=True)


if __name__ == "__main__":
    # Small shapes consistent with the module: seq=8, batch=2, input_size=16,
    # hidden_size=32, num_layers=2, bidirectional.
    T, B, D = 8, 2, 16
    hidden_size, num_layers = 32, 2

    key = jax.random.PRNGKey(0)
    key, kx = jax.random.split(key)
    x = jax.random.normal(kx, (T, B, D), jnp.float32)

    raw_params = init_encoder_params(key, D, hidden_size, num_layers)
    fused_params = build_fused_params(raw_params, hidden_size)

    hidden = encoder_forward(x, fused_params, hidden_size, num_layers)
    hidden = jax.block_until_ready(hidden)
    assert hidden.shape == (1, B, hidden_size)

    hidden_ref = jax.block_until_ready(encoder_forward_ref(x, raw_params, hidden_size))
    assert jnp.allclose(hidden, hidden_ref, atol=1e-4, rtol=1e-4), "mismatch vs JAX reference"

    print("KERNEL_OK")
</pallas_src>

<mosaic_0001>
module attributes {stable_mosaic.version = 11 : i64} {
  func.func @_encoder_kernel(%arg0: memref<8x2x16xf32, #tpu.memory_space<vmem>>, %arg1: memref<16x512xf32, #tpu.memory_space<vmem>>, %arg2: memref<64x256xf32, #tpu.memory_space<vmem>>, %arg3: memref<1x256xf32, #tpu.memory_space<vmem>>, %arg4: memref<64x512xf32, #tpu.memory_space<vmem>>, %arg5: memref<64x256xf32, #tpu.memory_space<vmem>>, %arg6: memref<1x256xf32, #tpu.memory_space<vmem>>, %arg7: memref<1x2x32xf32, #tpu.memory_space<vmem>>, %arg8: memref<8x2x64xf32, #tpu.memory_space<vmem>>) attributes {dimension_semantics = [], scalar_prefetch = 0 : i64, scratch_operands = 1 : i64, tpu.core_type = #tpu.core_type<tc>} {
    %cst = arith.constant 0.000000e+00 : f32
    %0 = vector.broadcast %cst : f32 to vector<2x32xf32>
    %c0 = arith.constant 0 : index
    %c0_0 = arith.constant 0 : index
    %1 = vector.load %arg2[%c0, %c0_0] : memref<64x256xf32, #tpu.memory_space<vmem>>, vector<64x256xf32>
    %c0_1 = arith.constant 0 : index
    %c0_2 = arith.constant 0 : index
    %2 = vector.load %arg3[%c0_1, %c0_2] : memref<1x256xf32, #tpu.memory_space<vmem>>, vector<1x256xf32>
    %c0_3 = arith.constant 0 : index
    %c0_4 = arith.constant 0 : index
    %c0_5 = arith.constant 0 : index
    %3 = vector.load %arg0[%c0_3, %c0_4, %c0_5] : memref<8x2x16xf32, #tpu.memory_space<vmem>>, vector<8x2x16xf32>
    %4 = vector.shape_cast %3 : vector<8x2x16xf32> to vector<16x16xf32>
    %c0_6 = arith.constant 0 : index
    %c0_7 = arith.constant 0 : index
    %5 = vector.load %arg1[%c0_6, %c0_7] : memref<16x512xf32, #tpu.memory_space<vmem>>, vector<16x512xf32>
    %cst_8 = arith.constant dense<0.000000e+00> : vector<16x512xf32>
    %6 = tpu.matmul %4, %5, %cst_8 {dimension_numbers = #tpu.dot_dimension_numbers<[1], [0], [0], [1], [0, 0, 1, 1], [], []>} : vector<16x16xf32>, vector<16x512xf32>, vector<16x512xf32> -> vector<16x512xf32>
    %7 = vector.shape_cast %6 : vector<16x512xf32> to vector<8x2x512xf32>
    %8 = vector.extract_strided_slice %7 {offsets = [0, 0, 0], sizes = [8, 2, 256], strides = [1, 1, 1]} : vector<8x2x512xf32> to vector<8x2x256xf32>
    %9 = vector.extract_strided_slice %7 {offsets = [0, 0, 256], sizes = [8, 2, 256], strides = [1, 1, 1]} : vector<8x2x512xf32> to vector<8x2x256xf32>
    %10 = vector.extract_strided_slice %8 {offsets = [0, 0, 0], sizes = [1, 2, 256], strides = [1, 1, 1]} : vector<8x2x256xf32> to vector<1x2x256xf32>
    %11 = vector.shape_cast %10 : vector<1x2x256xf32> to vector<2x256xf32>
    %12 = vector.extract_strided_slice %9 {offsets = [7, 0, 0], sizes = [1, 2, 256], strides = [1, 1, 1]} : vector<8x2x256xf32> to vector<1x2x256xf32>
    %13 = vector.shape_cast %12 : vector<1x2x256xf32> to vector<2x256xf32>
    %14 = arith.addf %11, %13 : vector<2x256xf32>
    %15 = vector.broadcast %2 : vector<1x256xf32> to vector<2x256xf32>
    %16 = arith.addf %14, %15 : vector<2x256xf32>
    %17 = vector.extract_strided_slice %8 {offsets = [1, 0, 0], sizes = [1, 2, 256], strides = [1, 1, 1]} : vector<8x2x256xf32> to vector<1x2x256xf32>
    %18 = vector.shape_cast %17 : vector<1x2x256xf32> to vector<2x256xf32>
    %19 = vector.extract_strided_slice %9 {offsets = [6, 0, 0], sizes = [1, 2, 256], strides = [1, 1, 1]} : vector<8x2x256xf32> to vector<1x2x256xf32>
    %20 = vector.shape_cast %19 : vector<1x2x256xf32> to vector<2x256xf32>
    %21 = arith.addf %18, %20 : vector<2x256xf32>
    %22 = vector.broadcast %2 : vector<1x256xf32> to vector<2x256xf32>
    %23 = arith.addf %21, %22 : vector<2x256xf32>
    %24 = vector.extract_strided_slice %8 {offsets = [2, 0, 0], sizes = [1, 2, 256], strides = [1, 1, 1]} : vector<8x2x256xf32> to vector<1x2x256xf32>
    %25 = vector.shape_cast %24 : vector<1x2x256xf32> to vector<2x256xf32>
    %26 = vector.extract_strided_slice %9 {offsets = [5, 0, 0], sizes = [1, 2, 256], strides = [1, 1, 1]} : vector<8x2x256xf32> to vector<1x2x256xf32>
    %27 = vector.shape_cast %26 : vector<1x2x256xf32> to vector<2x256xf32>
    %28 = arith.addf %25, %27 : vector<2x256xf32>
    %29 = vector.broadcast %2 : vector<1x256xf32> to vector<2x256xf32>
    %30 = arith.addf %28, %29 : vector<2x256xf32>
    %31 = vector.extract_strided_slice %8 {offsets = [3, 0, 0], sizes = [1, 2, 256], strides = [1, 1, 1]} : vector<8x2x256xf32> to vector<1x2x256xf32>
    %32 = vector.shape_cast %31 : vector<1x2x256xf32> to vector<2x256xf32>
    %33 = vector.extract_strided_slice %9 {offsets = [4, 0, 0], sizes = [1, 2, 256], strides = [1, 1, 1]} : vector<8x2x256xf32> to vector<1x2x256xf32>
    %34 = vector.shape_cast %33 : vector<1x2x256xf32> to vector<2x256xf32>
    %35 = arith.addf %32, %34 : vector<2x256xf32>
    %36 = vector.broadcast %2 : vector<1x256xf32> to vector<2x256xf32>
    %37 = arith.addf %35, %36 : vector<2x256xf32>
    %38 = vector.extract_strided_slice %8 {offsets = [4, 0, 0], sizes = [1, 2, 256], strides = [1, 1, 1]} : vector<8x2x256xf32> to vector<1x2x256xf32>
    %39 = vector.shape_cast %38 : vector<1x2x256xf32> to vector<2x256xf32>
    %40 = vector.extract_strided_slice %9 {offsets = [3, 0, 0], sizes = [1, 2, 256], strides = [1, 1, 1]} : vector<8x2x256xf32> to vector<1x2x256xf32>
    %41 = vector.shape_cast %40 : vector<1x2x256xf32> to vector<2x256xf32>
    %42 = arith.addf %39, %41 : vector<2x256xf32>
    %43 = vector.broadcast %2 : vector<1x256xf32> to vector<2x256xf32>
    %44 = arith.addf %42, %43 : vector<2x256xf32>
    %45 = vector.extract_strided_slice %8 {offsets = [5, 0, 0], sizes = [1, 2, 256], strides = [1, 1, 1]} : vector<8x2x256xf32> to vector<1x2x256xf32>
    %46 = vector.shape_cast %45 : vector<1x2x256xf32> to vector<2x256xf32>
    %47 = vector.extract_strided_slice %9 {offsets = [2, 0, 0], sizes = [1, 2, 256], strides = [1, 1, 1]} : vector<8x2x256xf32> to vector<1x2x256xf32>
    %48 = vector.shape_cast %47 : vector<1x2x256xf32> to vector<2x256xf32>
    %49 = arith.addf %46, %48 : vector<2x256xf32>
    %50 = vector.broadcast %2 : vector<1x256xf32> to vector<2x256xf32>
    %51 = arith.addf %49, %50 : vector<2x256xf32>
    %52 = vector.extract_strided_slice %8 {offsets = [6, 0, 0], sizes = [1, 2, 256], strides = [1, 1, 1]} : vector<8x2x256xf32> to vector<1x2x256xf32>
    %53 = vector.shape_cast %52 : vector<1x2x256xf32> to vector<2x256xf32>
    %54 = vector.extract_strided_slice %9 {offsets = [1, 0, 0], sizes = [1, 2, 256], strides = [1, 1, 1]} : vector<8x2x256xf32> to vector<1x2x256xf32>
    %55 = vector.shape_cast %54 : vector<1x2x256xf32> to vector<2x256xf32>
    %56 = arith.addf %53, %55 : vector<2x256xf32>
    %57 = vector.broadcast %2 : vector<1x256xf32> to vector<2x256xf32>
    %58 = arith.addf %56, %57 : vector<2x256xf32>
    %59 = vector.extract_strided_slice %8 {offsets = [7, 0, 0], sizes = [1, 2, 256], strides = [1, 1, 1]} : vector<8x2x256xf32> to vector<1x2x256xf32>
    %60 = vector.shape_cast %59 : vector<1x2x256xf32> to vector<2x256xf32>
    %61 = vector.extract_strided_slice %9 {offsets = [0, 0, 0], sizes = [1, 2, 256], strides = [1, 1, 1]} : vector<8x2x256xf32> to vector<1x2x256xf32>
    %62 = vector.shape_cast %61 : vector<1x2x256xf32> to vector<2x256xf32>
    %63 = arith.addf %60, %62 : vector<2x256xf32>
    %64 = vector.broadcast %2 : vector<1x256xf32> to vector<2x256xf32>
    %65 = arith.addf %63, %64 : vector<2x256xf32>
    %cst_9 = arith.constant 0.000000e+00 : f32
    %66 = vector.broadcast %cst_9 : f32 to vector<2x64xf32>
    %cst_10 = arith.constant 0.000000e+00 : f32
    %67 = vector.broadcast %cst_10 : f32 to vector<2x64xf32>
    %cst_11 = arith.constant dense<0.000000e+00> : vector<2x256xf32>
    %68 = tpu.matmul %66, %1, %cst_11 {dimension_numbers = #tpu.dot_dimension_numbers<[1], [0], [0], [1], [0, 0, 1, 1], [], []>} : vector<2x64xf32>, vector<64x256xf32>, vector<2x256xf32> -> vector<2x256xf32>
    %69 = arith.addf %16, %68 : vector<2x256xf32>
    %70 = vector.extract_strided_slice %69 {offsets = [0, 0], sizes = [2, 128], strides = [1, 1]} : vector<2x256xf32> to vector<2x128xf32>
    %71 = arith.negf %70 : vector<2x128xf32>
    %72 = math.exp %71 : vector<2x128xf32>
    %cst_12 = arith.constant 1.000000e+00 : f32
    %73 = vector.broadcast %cst_12 : f32 to vector<2x128xf32>
    %74 = arith.addf %73, %72 : vector<2x128xf32>
    %75 = arith.divf %73, %74 : vector<2x128xf32>
    %76 = vector.extract_strided_slice %75 {offsets = [0, 0], sizes = [2, 64], strides = [1, 1]} : vector<2x128xf32> to vector<2x64xf32>
    %77 = vector.extract_strided_slice %75 {offsets = [0, 64], sizes = [2, 64], strides = [1, 1]} : vector<2x128xf32> to vector<2x64xf32>
    %78 = vector.extract_strided_slice %69 {offsets = [0, 128], sizes = [2, 64], strides = [1, 1]} : vector<2x256xf32> to vector<2x64xf32>
    %79 = math.tanh %78 : vector<2x64xf32>
    %80 = vector.extract_strided_slice %69 {offsets = [0, 192], sizes = [2, 64], strides = [1, 1]} : vector<2x256xf32> to vector<2x64xf32>
    %81 = arith.negf %80 : vector<2x64xf32>
    %82 = math.exp %81 : vector<2x64xf32>
    %cst_13 = arith.constant 1.000000e+00 : f32
    %83 = vector.broadcast %cst_13 : f32 to vector<2x64xf32>
    %84 = arith.addf %83, %82 : vector<2x64xf32>
    %85 = arith.divf %83, %84 : vector<2x64xf32>
    %86 = arith.mulf %77, %67 : vector<2x64xf32>
    %87 = arith.mulf %76, %79 : vector<2x64xf32>
    %88 = arith.addf %86, %87 : vector<2x64xf32>
    %89 = math.tanh %88 : vector<2x64xf32>
    %90 = arith.mulf %85, %89 : vector<2x64xf32>
    %c0_14 = arith.constant 0 : index
    %c0_15 = arith.constant 0 : index
    %c0_16 = arith.constant 0 : index
    %91 = vector.load %arg8[%c0_14, %c0_15, %c0_16] : memref<8x2x64xf32, #tpu.memory_space<vmem>>, vector<1x2x64xf32>
    %92 = vector.shape_cast %91 : vector<1x2x64xf32> to vector<2x64xf32>
    %93 = vector.shape_cast %90 : vector<2x64xf32> to vector<1x2x64xf32>
    tpu.vector_store %arg8[%c0_14, %c0_15, %c0_16], %93 {strides = array<i32>} : memref<8x2x64xf32, #tpu.memory_space<vmem>>, vector<1x2x64xf32>,
    %cst_17 = arith.constant dense<0.000000e+00> : vector<2x256xf32>
    %94 = tpu.matmul %90, %1, %cst_17 {dimension_numbers = #tpu.dot_dimension_numbers<[1], [0], [0], [1], [0, 0, 1, 1], [], []>} : vector<2x64xf32>, vector<64x256xf32>, vector<2x256xf32> -> vector<2x256xf32>
    %95 = arith.addf %23, %94 : vector<2x256xf32>
    %96 = vector.extract_strided_slice %95 {offsets = [0, 0], sizes = [2, 128], strides = [1, 1]} : vector<2x256xf32> to vector<2x128xf32>
    %97 = arith.negf %96 : vector<2x128xf32>
    %98 = math.exp %97 : vector<2x128xf32>
    %cst_18 = arith.constant 1.000000e+00 : f32
    %99 = vector.broadcast %cst_18 : f32 to vector<2x128xf32>
    %100 = arith.addf %99, %98 : vector<2x128xf32>
    %101 = arith.divf %99, %100 : vector<2x128xf32>
    %102 = vector.extract_strided_slice %101 {offsets = [0, 0], sizes = [2, 64], strides = [1, 1]} : vector<2x128xf32> to vector<2x64xf32>
    %103 = vector.extract_strided_slice %101 {offsets = [0, 64], sizes = [2, 64], strides = [1, 1]} : vector<2x128xf32> to vector<2x64xf32>
    %104 = vector.extract_strided_slice %95 {offsets = [0, 128], sizes = [2, 64], strides = [1, 1]} : vector<2x256xf32> to vector<2x64xf32>
    %105 = math.tanh %104 : vector<2x64xf32>
    %106 = vector.extract_strided_slice %95 {offsets = [0, 192], sizes = [2, 64], strides = [1, 1]} : vector<2x256xf32> to vector<2x64xf32>
    %107 = arith.negf %106 : vector<2x64xf32>
    %108 = math.exp %107 : vector<2x64xf32>
    %cst_19 = arith.constant 1.000000e+00 : f32
    %109 = vector.broadcast %cst_19 : f32 to vector<2x64xf32>
    %110 = arith.addf %109, %108 : vector<2x64xf32>
    %111 = arith.divf %109, %110 : vector<2x64xf32>
    %112 = arith.mulf %103, %88 : vector<2x64xf32>
    %113 = arith.mulf %102, %105 : vector<2x64xf32>
    %114 = arith.addf %112, %113 : vector<2x64xf32>
    %115 = math.tanh %114 : vector<2x64xf32>
    %116 = arith.mulf %111, %115 : vector<2x64xf32>
    %c1 = arith.constant 1 : index
    %c0_20 = arith.constant 0 : index
    %c0_21 = arith.constant 0 : index
    %117 = vector.load %arg8[%c1, %c0_20, %c0_21] : memref<8x2x64xf32, #tpu.memory_space<vmem>>, vector<1x2x64xf32>
    %118 = vector.shape_cast %117 : vector<1x2x64xf32> to vector<2x64xf32>
    %119 = vector.shape_cast %116 : vector<2x64xf32> to vector<1x2x64xf32>
    tpu.vector_store %arg8[%c1, %c0_20, %c0_21], %119 {strides = array<i32>} : memref<8x2x64xf32, #tpu.memory_space<vmem>>, vector<1x2x64xf32>,
    %cst_22 = arith.constant dense<0.000000e+00> : vector<2x256xf32>
    %120 = tpu.matmul %116, %1, %cst_22 {dimension_numbers = #tpu.dot_dimension_numbers<[1], [0], [0], [1], [0, 0, 1, 1], [], []>} : vector<2x64xf32>, vector<64x256xf32>, vector<2x256xf32> -> vector<2x256xf32>
    %121 = arith.addf %30, %120 : vector<2x256xf32>
    %122 = vector.extract_strided_slice %121 {offsets = [0, 0], sizes = [2, 128], strides = [1, 1]} : vector<2x256xf32> to vector<2x128xf32>
    %123 = arith.negf %122 : vector<2x128xf32>
    %124 = math.exp %123 : vector<2x128xf32>
    %cst_23 = arith.constant 1.000000e+00 : f32
    %125 = vector.broadcast %cst_23 : f32 to vector<2x128xf32>
    %126 = arith.addf %125, %124 : vector<2x128xf32>
    %127 = arith.divf %125, %126 : vector<2x128xf32>
    %128 = vector.extract_strided_slice %127 {offsets = [0, 0], sizes = [2, 64], strides = [1, 1]} : vector<2x128xf32> to vector<2x64xf32>
    %129 = vector.extract_strided_slice %127 {offsets = [0, 64], sizes = [2, 64], strides = [1, 1]} : vector<2x128xf32> to vector<2x64xf32>
    %130 = vector.extract_strided_slice %121 {offsets = [0, 128], sizes = [2, 64], strides = [1, 1]} : vector<2x256xf32> to vector<2x64xf32>
    %131 = math.tanh %130 : vector<2x64xf32>
    %132 = vector.extract_strided_slice %121 {offsets = [0, 192], sizes = [2, 64], strides = [1, 1]} : vector<2x256xf32> to vector<2x64xf32>
    %133 = arith.negf %132 : vector<2x64xf32>
    %134 = math.exp %133 : vector<2x64xf32>
    %cst_24 = arith.constant 1.000000e+00 : f32
    %135 = vector.broadcast %cst_24 : f32 to vector<2x64xf32>
    %136 = arith.addf %135, %134 : vector<2x64xf32>
    %137 = arith.divf %135, %136 : vector<2x64xf32>
    %138 = arith.mulf %129, %114 : vector<2x64xf32>
    %139 = arith.mulf %128, %131 : vector<2x64xf32>
    %140 = arith.addf %138, %139 : vector<2x64xf32>
    %141 = math.tanh %140 : vector<2x64xf32>
    %142 = arith.mulf %137, %141 : vector<2x64xf32>
    %c2 = arith.constant 2 : index
    %c0_25 = arith.constant 0 : index
    %c0_26 = arith.constant 0 : index
    %143 = vector.load %arg8[%c2, %c0_25, %c0_26] : memref<8x2x64xf32, #tpu.memory_space<vmem>>, vector<1x2x64xf32>
    %144 = vector.shape_cast %143 : vector<1x2x64xf32> to vector<2x64xf32>
    %145 = vector.shape_cast %142 : vector<2x64xf32> to vector<1x2x64xf32>
    tpu.vector_store %arg8[%c2, %c0_25, %c0_26], %145 {strides = array<i32>} : memref<8x2x64xf32, #tpu.memory_space<vmem>>, vector<1x2x64xf32>,
    %cst_27 = arith.constant dense<0.000000e+00> : vector<2x256xf32>
    %146 = tpu.matmul %142, %1, %cst_27 {dimension_numbers = #tpu.dot_dimension_numbers<[1], [0], [0], [1], [0, 0, 1, 1], [], []>} : vector<2x64xf32>, vector<64x256xf32>, vector<2x256xf32> -> vector<2x256xf32>
    %147 = arith.addf %37, %146 : vector<2x256xf32>
    %148 = vector.extract_strided_slice %147 {offsets = [0, 0], sizes = [2, 128], strides = [1, 1]} : vector<2x256xf32> to vector<2x128xf32>
    %149 = arith.negf %148 : vector<2x128xf32>
    %150 = math.exp %149 : vector<2x128xf32>
    %cst_28 = arith.constant 1.000000e+00 : f32
    %151 = vector.broadcast %cst_28 : f32 to vector<2x128xf32>
    %152 = arith.addf %151, %150 : vector<2x128xf32>
    %153 = arith.divf %151, %152 : vector<2x128xf32>
    %154 = vector.extract_strided_slice %153 {offsets = [0, 0], sizes = [2, 64], strides = [1, 1]} : vector<2x128xf32> to vector<2x64xf32>
    %155 = vector.extract_strided_slice %153 {offsets = [0, 64], sizes = [2, 64], strides = [1, 1]} : vector<2x128xf32> to vector<2x64xf32>
    %156 = vector.extract_strided_slice %147 {offsets = [0, 128], sizes = [2, 64], strides = [1, 1]} : vector<2x256xf32> to vector<2x64xf32>
    %157 = math.tanh %156 : vector<2x64xf32>
    %158 = vector.extract_strided_slice %147 {offsets = [0, 192], sizes = [2, 64], strides = [1, 1]} : vector<2x256xf32> to vector<2x64xf32>
    %159 = arith.negf %158 : vector<2x64xf32>
    %160 = math.exp %159 : vector<2x64xf32>
    %cst_29 = arith.constant 1.000000e+00 : f32
    %161 = vector.broadcast %cst_29 : f32 to vector<2x64xf32>
    %162 = arith.addf %161, %160 : vector<2x64xf32>
    %163 = arith.divf %161, %162 : vector<2x64xf32>
    %164 = arith.mulf %155, %140 : vector<2x64xf32>
    %165 = arith.mulf %154, %157 : vector<2x64xf32>
    %166 = arith.addf %164, %165 : vector<2x64xf32>
    %167 = math.tanh %166 : vector<2x64xf32>
    %168 = arith.mulf %163, %167 : vector<2x64xf32>
    %c3 = arith.constant 3 : index
    %c0_30 = arith.constant 0 : index
    %c0_31 = arith.constant 0 : index
    %169 = vector.load %arg8[%c3, %c0_30, %c0_31] : memref<8x2x64xf32, #tpu.memory_space<vmem>>, vector<1x2x64xf32>
    %170 = vector.shape_cast %169 : vector<1x2x64xf32> to vector<2x64xf32>
    %171 = vector.shape_cast %168 : vector<2x64xf32> to vector<1x2x64xf32>
    tpu.vector_store %arg8[%c3, %c0_30, %c0_31], %171 {strides = array<i32>} : memref<8x2x64xf32, #tpu.memory_space<vmem>>, vector<1x2x64xf32>,
    %cst_32 = arith.constant dense<0.000000e+00> : vector<2x256xf32>
    %172 = tpu.matmul %168, %1, %cst_32 {dimension_numbers = #tpu.dot_dimension_numbers<[1], [0], [0], [1], [0, 0, 1, 1], [], []>} : vector<2x64xf32>, vector<64x256xf32>, vector<2x256xf32> -> vector<2x256xf32>
    %173 = arith.addf %44, %172 : vector<2x256xf32>
    %174 = vector.extract_strided_slice %173 {offsets = [0, 0], sizes = [2, 128], strides = [1, 1]} : vector<2x256xf32> to vector<2x128xf32>
    %175 = arith.negf %174 : vector<2x128xf32>
    %176 = math.exp %175 : vector<2x128xf32>
    %cst_33 = arith.constant 1.000000e+00 : f32
    %177 = vector.broadcast %cst_33 : f32 to vector<2x128xf32>
    %178 = arith.addf %177, %176 : vector<2x128xf32>
    %179 = arith.divf %177, %178 : vector<2x128xf32>
    %180 = vector.extract_strided_slice %179 {offsets = [0, 0], sizes = [2, 64], strides = [1, 1]} : vector<2x128xf32> to vector<2x64xf32>
    %181 = vector.extract_strided_slice %179 {offsets = [0, 64], sizes = [2, 64], strides = [1, 1]} : vector<2x128xf32> to vector<2x64xf32>
    %182 = vector.extract_strided_slice %173 {offsets = [0, 128], sizes = [2, 64], strides = [1, 1]} : vector<2x256xf32> to vector<2x64xf32>
    %183 = math.tanh %182 : vector<2x64xf32>
    %184 = vector.extract_strided_slice %173 {offsets = [0, 192], sizes = [2, 64], strides = [1, 1]} : vector<2x256xf32> to vector<2x64xf32>
    %185 = arith.negf %184 : vector<2x64xf32>
    %186 = math.exp %185 : vector<2x64xf32>
    %cst_34 = arith.constant 1.000000e+00 : f32
    %187 = vector.broadcast %cst_34 : f32 to vector<2x64xf32>
    %188 = arith.addf %187, %186 : vector<2x64xf32>
    %189 = arith.divf %187, %188 : vector<2x64xf32>
    %190 = arith.mulf %181, %166 : vector<2x64xf32>
    %191 = arith.mulf %180, %183 : vector<2x64xf32>
    %192 = arith.addf %190, %191 : vector<2x64xf32>
    %193 = math.tanh %192 : vector<2x64xf32>
    %194 = arith.mulf %189, %193 : vector<2x64xf32>
    %c4 = arith.constant 4 : index
    %c0_35 = arith.constant 0 : index
    %c0_36 = arith.constant 0 : index
    %195 = vector.load %arg8[%c4, %c0_35, %c0_36] : memref<8x2x64xf32, #tpu.memory_space<vmem>>, vector<1x2x64xf32>
    %196 = vector.shape_cast %195 : vector<1x2x64xf32> to vector<2x64xf32>
    %197 = vector.shape_cast %194 : vector<2x64xf32> to vector<1x2x64xf32>
    tpu.vector_store %arg8[%c4, %c0_35, %c0_36], %197 {strides = array<i32>} : memref<8x2x64xf32, #tpu.memory_space<vmem>>, vector<1x2x64xf32>,
    %cst_37 = arith.constant dense<0.000000e+00> : vector<2x256xf32>
    %198 = tpu.matmul %194, %1, %cst_37 {dimension_numbers = #tpu.dot_dimension_numbers<[1], [0], [0], [1], [0, 0, 1, 1], [], []>} : vector<2x64xf32>, vector<64x256xf32>, vector<2x256xf32> -> vector<2x256xf32>
    %199 = arith.addf %51, %198 : vector<2x256xf32>
    %200 = vector.extract_strided_slice %199 {offsets = [0, 0], sizes = [2, 128], strides = [1, 1]} : vector<2x256xf32> to vector<2x128xf32>
    %201 = arith.negf %200 : vector<2x128xf32>
    %202 = math.exp %201 : vector<2x128xf32>
    %cst_38 = arith.constant 1.000000e+00 : f32
    %203 = vector.broadcast %cst_38 : f32 to vector<2x128xf32>
    %204 = arith.addf %203, %202 : vector<2x128xf32>
    %205 = arith.divf %203, %204 : vector<2x128xf32>
    %206 = vector.extract_strided_slice %205 {offsets = [0, 0], sizes = [2, 64], strides = [1, 1]} : vector<2x128xf32> to vector<2x64xf32>
    %207 = vector.extract_strided_slice %205 {offsets = [0, 64], sizes = [2, 64], strides = [1, 1]} : vector<2x128xf32> to vector<2x64xf32>
    %208 = vector.extract_strided_slice %199 {offsets = [0, 128], sizes = [2, 64], strides = [1, 1]} : vector<2x256xf32> to vector<2x64xf32>
    %209 = math.tanh %208 : vector<2x64xf32>
    %210 = vector.extract_strided_slice %199 {offsets = [0, 192], sizes = [2, 64], strides = [1, 1]} : vector<2x256xf32> to vector<2x64xf32>
    %211 = arith.negf %210 : vector<2x64xf32>
    %212 = math.exp %211 : vector<2x64xf32>
    %cst_39 = arith.constant 1.000000e+00 : f32
    %213 = vector.broadcast %cst_39 : f32 to vector<2x64xf32>
    %214 = arith.addf %213, %212 : vector<2x64xf32>
    %215 = arith.divf %213, %214 : vector<2x64xf32>
    %216 = arith.mulf %207, %192 : vector<2x64xf32>
    %217 = arith.mulf %206, %209 : vector<2x64xf32>
    %218 = arith.addf %216, %217 : vector<2x64xf32>
    %219 = math.tanh %218 : vector<2x64xf32>
    %220 = arith.mulf %215, %219 : vector<2x64xf32>
    %c5 = arith.constant 5 : index
    %c0_40 = arith.constant 0 : index
    %c0_41 = arith.constant 0 : index
    %221 = vector.load %arg8[%c5, %c0_40, %c0_41] : memref<8x2x64xf32, #tpu.memory_space<vmem>>, vector<1x2x64xf32>
    %222 = vector.shape_cast %221 : vector<1x2x64xf32> to vector<2x64xf32>
    %223 = vector.shape_cast %220 : vector<2x64xf32> to vector<1x2x64xf32>
    tpu.vector_store %arg8[%c5, %c0_40, %c0_41], %223 {strides = array<i32>} : memref<8x2x64xf32, #tpu.memory_space<vmem>>, vector<1x2x64xf32>,
    %cst_42 = arith.constant dense<0.000000e+00> : vector<2x256xf32>
    %224 = tpu.matmul %220, %1, %cst_42 {dimension_numbers = #tpu.dot_dimension_numbers<[1], [0], [0], [1], [0, 0, 1, 1], [], []>} : vector<2x64xf32>, vector<64x256xf32>, vector<2x256xf32> -> vector<2x256xf32>
    %225 = arith.addf %58, %224 : vector<2x256xf32>
    %226 = vector.extract_strided_slice %225 {offsets = [0, 0], sizes = [2, 128], strides = [1, 1]} : vector<2x256xf32> to vector<2x128xf32>
    %227 = arith.negf %226 : vector<2x128xf32>
    %228 = math.exp %227 : vector<2x128xf32>
    %cst_43 = arith.constant 1.000000e+00 : f32
    %229 = vector.broadcast %cst_43 : f32 to vector<2x128xf32>
    %230 = arith.addf %229, %228 : vector<2x128xf32>
    %231 = arith.divf %229, %230 : vector<2x128xf32>
    %232 = vector.extract_strided_slice %231 {offsets = [0, 0], sizes = [2, 64], strides = [1, 1]} : vector<2x128xf32> to vector<2x64xf32>
    %233 = vector.extract_strided_slice %231 {offsets = [0, 64], sizes = [2, 64], strides = [1, 1]} : vector<2x128xf32> to vector<2x64xf32>
    %234 = vector.extract_strided_slice %225 {offsets = [0, 128], sizes = [2, 64], strides = [1, 1]} : vector<2x256xf32> to vector<2x64xf32>
    %235 = math.tanh %234 : vector<2x64xf32>
    %236 = vector.extract_strided_slice %225 {offsets = [0, 192], sizes = [2, 64], strides = [1, 1]} : vector<2x256xf32> to vector<2x64xf32>
    %237 = arith.negf %236 : vector<2x64xf32>
    %238 = math.exp %237 : vector<2x64xf32>
    %cst_44 = arith.constant 1.000000e+00 : f32
    %239 = vector.broadcast %cst_44 : f32 to vector<2x64xf32>
    %240 = arith.addf %239, %238 : vector<2x64xf32>
    %241 = arith.divf %239, %240 : vector<2x64xf32>
    %242 = arith.mulf %233, %218 : vector<2x64xf32>
    %243 = arith.mulf %232, %235 : vector<2x64xf32>
    %244 = arith.addf %242, %243 : vector<2x64xf32>
    %245 = math.tanh %244 : vector<2x64xf32>
    %246 = arith.mulf %241, %245 : vector<2x64xf32>
    %c6 = arith.constant 6 : index
    %c0_45 = arith.constant 0 : index
    %c0_46 = arith.constant 0 : index
    %247 = vector.load %arg8[%c6, %c0_45, %c0_46] : memref<8x2x64xf32, #tpu.memory_space<vmem>>, vector<1x2x64xf32>
    %248 = vector.shape_cast %247 : vector<1x2x64xf32> to vector<2x64xf32>
    %249 = vector.shape_cast %246 : vector<2x64xf32> to vector<1x2x64xf32>
    tpu.vector_store %arg8[%c6, %c0_45, %c0_46], %249 {strides = array<i32>} : memref<8x2x64xf32, #tpu.memory_space<vmem>>, vector<1x2x64xf32>,
    %cst_47 = arith.constant dense<0.000000e+00> : vector<2x256xf32>
    %250 = tpu.matmul %246, %1, %cst_47 {dimension_numbers = #tpu.dot_dimension_numbers<[1], [0], [0], [1], [0, 0, 1, 1], [], []>} : vector<2x64xf32>, vector<64x256xf32>, vector<2x256xf32> -> vector<2x256xf32>
    %251 = arith.addf %65, %250 : vector<2x256xf32>
    %252 = vector.extract_strided_slice %251 {offsets = [0, 0], sizes = [2, 128], strides = [1, 1]} : vector<2x256xf32> to vector<2x128xf32>
    %253 = arith.negf %252 : vector<2x128xf32>
    %254 = math.exp %253 : vector<2x128xf32>
    %cst_48 = arith.constant 1.000000e+00 : f32
    %255 = vector.broadcast %cst_48 : f32 to vector<2x128xf32>
    %256 = arith.addf %255, %254 : vector<2x128xf32>
    %257 = arith.divf %255, %256 : vector<2x128xf32>
    %258 = vector.extract_strided_slice %257 {offsets = [0, 0], sizes = [2, 64], strides = [1, 1]} : vector<2x128xf32> to vector<2x64xf32>
    %259 = vector.extract_strided_slice %257 {offsets = [0, 64], sizes = [2, 64], strides = [1, 1]} : vector<2x128xf32> to vector<2x64xf32>
    %260 = vector.extract_strided_slice %251 {offsets = [0, 128], sizes = [2, 64], strides = [1, 1]} : vector<2x256xf32> to vector<2x64xf32>
    %261 = math.tanh %260 : vector<2x64xf32>
    %262 = vector.extract_strided_slice %251 {offsets = [0, 192], sizes = [2, 64], strides = [1, 1]} : vector<2x256xf32> to vector<2x64xf32>
    %263 = arith.negf %262 : vector<2x64xf32>
    %264 = math.exp %263 : vector<2x64xf32>
    %cst_49 = arith.constant 1.000000e+00 : f32
    %265 = vector.broadcast %cst_49 : f32 to vector<2x64xf32>
    %266 = arith.addf %265, %264 : vector<2x64xf32>
    %267 = arith.divf %265, %266 : vector<2x64xf32>
    %268 = arith.mulf %259, %244 : vector<2x64xf32>
    %269 = arith.mulf %258, %261 : vector<2x64xf32>
    %270 = arith.addf %268, %269 : vector<2x64xf32>
    %271 = math.tanh %270 : vector<2x64xf32>
    %272 = arith.mulf %267, %271 : vector<2x64xf32>
    %c7 = arith.constant 7 : index
    %c0_50 = arith.constant 0 : index
    %c0_51 = arith.constant 0 : index
    %273 = vector.load %arg8[%c7, %c0_50, %c0_51] : memref<8x2x64xf32, #tpu.memory_space<vmem>>, vector<1x2x64xf32>
    %274 = vector.shape_cast %273 : vector<1x2x64xf32> to vector<2x64xf32>
    %275 = vector.shape_cast %272 : vector<2x64xf32> to vector<1x2x64xf32>
    tpu.vector_store %arg8[%c7, %c0_50, %c0_51], %275 {strides = array<i32>} : memref<8x2x64xf32, #tpu.memory_space<vmem>>, vector<1x2x64xf32>,
    %276 = vector.extract_strided_slice %272 {offsets = [0, 0], sizes = [2, 32], strides = [1, 1]} : vector<2x64xf32> to vector<2x32xf32>
    %277 = arith.addf %0, %276 : vector<2x32xf32>
    %278 = vector.extract_strided_slice %272 {offsets = [0, 32], sizes = [2, 32], strides = [1, 1]} : vector<2x64xf32> to vector<2x32xf32>
    %279 = arith.addf %277, %278 : vector<2x32xf32>
    %c0_52 = arith.constant 0 : index
    %c0_53 = arith.constant 0 : index
    %280 = vector.load %arg5[%c0_52, %c0_53] : memref<64x256xf32, #tpu.memory_space<vmem>>, vector<64x256xf32>
    %c0_54 = arith.constant 0 : index
    %c0_55 = arith.constant 0 : index
    %281 = vector.load %arg6[%c0_54, %c0_55] : memref<1x256xf32, #tpu.memory_space<vmem>>, vector<1x256xf32>
    %c0_56 = arith.constant 0 : index
    %c0_57 = arith.constant 0 : index
    %c0_58 = arith.constant 0 : index
    %282 = vector.load %arg8[%c0_56, %c0_57, %c0_58] : memref<8x2x64xf32, #tpu.memory_space<vmem>>, vector<8x2x64xf32>
    %283 = vector.shape_cast %282 : vector<8x2x64xf32> to vector<16x64xf32>
    %c0_59 = arith.constant 0 : index
    %c0_60 = arith.constant 0 : index
    %284 = vector.load %arg4[%c0_59, %c0_60] : memref<64x512xf32, #tpu.memory_space<vmem>>, vector<64x512xf32>
    %cst_61 = arith.constant dense<0.000000e+00> : vector<16x512xf32>
    %285 = tpu.matmul %283, %284, %cst_61 {dimension_numbers = #tpu.dot_dimension_numbers<[1], [0], [0], [1], [0, 0, 1, 1], [], []>} : vector<16x64xf32>, vector<64x512xf32>, vector<16x512xf32> -> vector<16x512xf32>
    %286 = vector.shape_cast %285 : vector<16x512xf32> to vector<8x2x512xf32>
    %287 = vector.extract_strided_slice %286 {offsets = [0, 0, 0], sizes = [8, 2, 256], strides = [1, 1, 1]} : vector<8x2x512xf32> to vector<8x2x256xf32>
    %288 = vector.extract_strided_slice %286 {offsets = [0, 0, 256], sizes = [8, 2, 256], strides = [1, 1, 1]} : vector<8x2x512xf32> to vector<8x2x256xf32>
    %289 = vector.extract_strided_slice %287 {offsets = [0, 0, 0], sizes = [1, 2, 256], strides = [1, 1, 1]} : vector<8x2x256xf32> to vector<1x2x256xf32>
    %290 = vector.shape_cast %289 : vector<1x2x256xf32> to vector<2x256xf32>
    %291 = vector.extract_strided_slice %288 {offsets = [7, 0, 0], sizes = [1, 2, 256], strides = [1, 1, 1]} : vector<8x2x256xf32> to vector<1x2x256xf32>
    %292 = vector.shape_cast %291 : vector<1x2x256xf32> to vector<2x256xf32>
    %293 = arith.addf %290, %292 : vector<2x256xf32>
    %294 = vector.broadcast %281 : vector<1x256xf32> to vector<2x256xf32>
    %295 = arith.addf %293, %294 : vector<2x256xf32>
    %296 = vector.extract_strided_slice %287 {offsets = [1, 0, 0], sizes = [1, 2, 256], strides = [1, 1, 1]} : vector<8x2x256xf32> to vector<1x2x256xf32>
    %297 = vector.shape_cast %296 : vector<1x2x256xf32> to vector<2x256xf32>
    %298 = vector.extract_strided_slice %288 {offsets = [6, 0, 0], sizes = [1, 2, 256], strides = [1, 1, 1]} : vector<8x2x256xf32> to vector<1x2x256xf32>
    %299 = vector.shape_cast %298 : vector<1x2x256xf32> to vector<2x256xf32>
    %300 = arith.addf %297, %299 : vector<2x256xf32>
    %301 = vector.broadcast %281 : vector<1x256xf32> to vector<2x256xf32>
    %302 = arith.addf %300, %301 : vector<2x256xf32>
    %303 = vector.extract_strided_slice %287 {offsets = [2, 0, 0], sizes = [1, 2, 256], strides = [1, 1, 1]} : vector<8x2x256xf32> to vector<1x2x256xf32>
    %304 = vector.shape_cast %303 : vector<1x2x256xf32> to vector<2x256xf32>
    %305 = vector.extract_strided_slice %288 {offsets = [5, 0, 0], sizes = [1, 2, 256], strides = [1, 1, 1]} : vector<8x2x256xf32> to vector<1x2x256xf32>
    %306 = vector.shape_cast %305 : vector<1x2x256xf32> to vector<2x256xf32>
    %307 = arith.addf %304, %306 : vector<2x256xf32>
    %308 = vector.broadcast %281 : vector<1x256xf32> to vector<2x256xf32>
    %309 = arith.addf %307, %308 : vector<2x256xf32>
    %310 = vector.extract_strided_slice %287 {offsets = [3, 0, 0], sizes = [1, 2, 256], strides = [1, 1, 1]} : vector<8x2x256xf32> to vector<1x2x256xf32>
    %311 = vector.shape_cast %310 : vector<1x2x256xf32> to vector<2x256xf32>
    %312 = vector.extract_strided_slice %288 {offsets = [4, 0, 0], sizes = [1, 2, 256], strides = [1, 1, 1]} : vector<8x2x256xf32> to vector<1x2x256xf32>
    %313 = vector.shape_cast %312 : vector<1x2x256xf32> to vector<2x256xf32>
    %314 = arith.addf %311, %313 : vector<2x256xf32>
    %315 = vector.broadcast %281 : vector<1x256xf32> to vector<2x256xf32>
    %316 = arith.addf %314, %315 : vector<2x256xf32>
    %317 = vector.extract_strided_slice %287 {offsets = [4, 0, 0], sizes = [1, 2, 256], strides = [1, 1, 1]} : vector<8x2x256xf32> to vector<1x2x256xf32>
    %318 = vector.shape_cast %317 : vector<1x2x256xf32> to vector<2x256xf32>
    %319 = vector.extract_strided_slice %288 {offsets = [3, 0, 0], sizes = [1, 2, 256], strides = [1, 1, 1]} : vector<8x2x256xf32> to vector<1x2x256xf32>
    %320 = vector.shape_cast %319 : vector<1x2x256xf32> to vector<2x256xf32>
    %321 = arith.addf %318, %320 : vector<2x256xf32>
    %322 = vector.broadcast %281 : vector<1x256xf32> to vector<2x256xf32>
    %323 = arith.addf %321, %322 : vector<2x256xf32>
    %324 = vector.extract_strided_slice %287 {offsets = [5, 0, 0], sizes = [1, 2, 256], strides = [1, 1, 1]} : vector<8x2x256xf32> to vector<1x2x256xf32>
    %325 = vector.shape_cast %324 : vector<1x2x256xf32> to vector<2x256xf32>
    %326 = vector.extract_strided_slice %288 {offsets = [2, 0, 0], sizes = [1, 2, 256], strides = [1, 1, 1]} : vector<8x2x256xf32> to vector<1x2x256xf32>
    %327 = vector.shape_cast %326 : vector<1x2x256xf32> to vector<2x256xf32>
    %328 = arith.addf %325, %327 : vector<2x256xf32>
    %329 = vector.broadcast %281 : vector<1x256xf32> to vector<2x256xf32>
    %330 = arith.addf %328, %329 : vector<2x256xf32>
    %331 = vector.extract_strided_slice %287 {offsets = [6, 0, 0], sizes = [1, 2, 256], strides = [1, 1, 1]} : vector<8x2x256xf32> to vector<1x2x256xf32>
    %332 = vector.shape_cast %331 : vector<1x2x256xf32> to vector<2x256xf32>
    %333 = vector.extract_strided_slice %288 {offsets = [1, 0, 0], sizes = [1, 2, 256], strides = [1, 1, 1]} : vector<8x2x256xf32> to vector<1x2x256xf32>
    %334 = vector.shape_cast %333 : vector<1x2x256xf32> to vector<2x256xf32>
    %335 = arith.addf %332, %334 : vector<2x256xf32>
    %336 = vector.broadcast %281 : vector<1x256xf32> to vector<2x256xf32>
    %337 = arith.addf %335, %336 : vector<2x256xf32>
    %338 = vector.extract_strided_slice %287 {offsets = [7, 0, 0], sizes = [1, 2, 256], strides = [1, 1, 1]} : vector<8x2x256xf32> to vector<1x2x256xf32>
    %339 = vector.shape_cast %338 : vector<1x2x256xf32> to vector<2x256xf32>
    %340 = vector.extract_strided_slice %288 {offsets = [0, 0, 0], sizes = [1, 2, 256], strides = [1, 1, 1]} : vector<8x2x256xf32> to vector<1x2x256xf32>
    %341 = vector.shape_cast %340 : vector<1x2x256xf32> to vector<2x256xf32>
    %342 = arith.addf %339, %341 : vector<2x256xf32>
    %343 = vector.broadcast %281 : vector<1x256xf32> to vector<2x256xf32>
    %344 = arith.addf %342, %343 : vector<2x256xf32>
    %cst_62 = arith.constant 0.000000e+00 : f32
    %345 = vector.broadcast %cst_62 : f32 to vector<2x64xf32>
    %cst_63 = arith.constant 0.000000e+00 : f32
    %346 = vector.broadcast %cst_63 : f32 to vector<2x64xf32>
    %cst_64 = arith.constant dense<0.000000e+00> : vector<2x256xf32>
    %347 = tpu.matmul %345, %280, %cst_64 {dimension_numbers = #tpu.dot_dimension_numbers<[1], [0], [0], [1], [0, 0, 1, 1], [], []>} : vector<2x64xf32>, vector<64x256xf32>, vector<2x256xf32> -> vector<2x256xf32>
    %348 = arith.addf %295, %347 : vector<2x256xf32>
    %349 = vector.extract_strided_slice %348 {offsets = [0, 0], sizes = [2, 128], strides = [1, 1]} : vector<2x256xf32> to vector<2x128xf32>
    %350 = arith.negf %349 : vector<2x128xf32>
    %351 = math.exp %350 : vector<2x128xf32>
    %cst_65 = arith.constant 1.000000e+00 : f32
    %352 = vector.broadcast %cst_65 : f32 to vector<2x128xf32>
    %353 = arith.addf %352, %351 : vector<2x128xf32>
    %354 = arith.divf %352, %353 : vector<2x128xf32>
    %355 = vector.extract_strided_slice %354 {offsets = [0, 0], sizes = [2, 64], strides = [1, 1]} : vector<2x128xf32> to vector<2x64xf32>
    %356 = vector.extract_strided_slice %354 {offsets = [0, 64], sizes = [2, 64], strides = [1, 1]} : vector<2x128xf32> to vector<2x64xf32>
    %357 = vector.extract_strided_slice %348 {offsets = [0, 128], sizes = [2, 64], strides = [1, 1]} : vector<2x256xf32> to vector<2x64xf32>
    %358 = math.tanh %357 : vector<2x64xf32>
    %359 = vector.extract_strided_slice %348 {offsets = [0, 192], sizes = [2, 64], strides = [1, 1]} : vector<2x256xf32> to vector<2x64xf32>
    %360 = arith.negf %359 : vector<2x64xf32>
    %361 = math.exp %360 : vector<2x64xf32>
    %cst_66 = arith.constant 1.000000e+00 : f32
    %362 = vector.broadcast %cst_66 : f32 to vector<2x64xf32>
    %363 = arith.addf %362, %361 : vector<2x64xf32>
    %364 = arith.divf %362, %363 : vector<2x64xf32>
    %365 = arith.mulf %356, %346 : vector<2x64xf32>
    %366 = arith.mulf %355, %358 : vector<2x64xf32>
    %367 = arith.addf %365, %366 : vector<2x64xf32>
    %368 = math.tanh %367 : vector<2x64xf32>
    %369 = arith.mulf %364, %368 : vector<2x64xf32>
    %cst_67 = arith.constant dense<0.000000e+00> : vector<2x256xf32>
    %370 = tpu.matmul %369, %280, %cst_67 {dimension_numbers = #tpu.dot_dimension_numbers<[1], [0], [0], [1], [0, 0, 1, 1], [], []>} : vector<2x64xf32>, vector<64x256xf32>, vector<2x256xf32> -> vector<2x256xf32>
    %371 = arith.addf %302, %370 : vector<2x256xf32>
    %372 = vector.extract_strided_slice %371 {offsets = [0, 0], sizes = [2, 128], strides = [1, 1]} : vector<2x256xf32> to vector<2x128xf32>
    %373 = arith.negf %372 : vector<2x128xf32>
    %374 = math.exp %373 : vector<2x128xf32>
    %cst_68 = arith.constant 1.000000e+00 : f32
    %375 = vector.broadcast %cst_68 : f32 to vector<2x128xf32>
    %376 = arith.addf %375, %374 : vector<2x128xf32>
    %377 = arith.divf %375, %376 : vector<2x128xf32>
    %378 = vector.extract_strided_slice %377 {offsets = [0, 0], sizes = [2, 64], strides = [1, 1]} : vector<2x128xf32> to vector<2x64xf32>
    %379 = vector.extract_strided_slice %377 {offsets = [0, 64], sizes = [2, 64], strides = [1, 1]} : vector<2x128xf32> to vector<2x64xf32>
    %380 = vector.extract_strided_slice %371 {offsets = [0, 128], sizes = [2, 64], strides = [1, 1]} : vector<2x256xf32> to vector<2x64xf32>
    %381 = math.tanh %380 : vector<2x64xf32>
    %382 = vector.extract_strided_slice %371 {offsets = [0, 192], sizes = [2, 64], strides = [1, 1]} : vector<2x256xf32> to vector<2x64xf32>
    %383 = arith.negf %382 : vector<2x64xf32>
    %384 = math.exp %383 : vector<2x64xf32>
    %cst_69 = arith.constant 1.000000e+00 : f32
    %385 = vector.broadcast %cst_69 : f32 to vector<2x64xf32>
    %386 = arith.addf %385, %384 : vector<2x64xf32>
    %387 = arith.divf %385, %386 : vector<2x64xf32>
    %388 = arith.mulf %379, %367 : vector<2x64xf32>
    %389 = arith.mulf %378, %381 : vector<2x64xf32>
    %390 = arith.addf %388, %389 : vector<2x64xf32>
    %391 = math.tanh %390 : vector<2x64xf32>
    %392 = arith.mulf %387, %391 : vector<2x64xf32>
    %cst_70 = arith.constant dense<0.000000e+00> : vector<2x256xf32>
    %393 = tpu.matmul %392, %280, %cst_70 {dimension_numbers = #tpu.dot_dimension_numbers<[1], [0], [0], [1], [0, 0, 1, 1], [], []>} : vector<2x64xf32>, vector<64x256xf32>, vector<2x256xf32> -> vector<2x256xf32>
    %394 = arith.addf %309, %393 : vector<2x256xf32>
    %395 = vector.extract_strided_slice %394 {offsets = [0, 0], sizes = [2, 128], strides = [1, 1]} : vector<2x256xf32> to vector<2x128xf32>
    %396 = arith.negf %395 : vector<2x128xf32>
    %397 = math.exp %396 : vector<2x128xf32>
    %cst_71 = arith.constant 1.000000e+00 : f32
    %398 = vector.broadcast %cst_71 : f32 to vector<2x128xf32>
    %399 = arith.addf %398, %397 : vector<2x128xf32>
    %400 = arith.divf %398, %399 : vector<2x128xf32>
    %401 = vector.extract_strided_slice %400 {offsets = [0, 0], sizes = [2, 64], strides = [1, 1]} : vector<2x128xf32> to vector<2x64xf32>
    %402 = vector.extract_strided_slice %400 {offsets = [0, 64], sizes = [2, 64], strides = [1, 1]} : vector<2x128xf32> to vector<2x64xf32>
    %403 = vector.extract_strided_slice %394 {offsets = [0, 128], sizes = [2, 64], strides = [1, 1]} : vector<2x256xf32> to vector<2x64xf32>
    %404 = math.tanh %403 : vector<2x64xf32>
    %405 = vector.extract_strided_slice %394 {offsets = [0, 192], sizes = [2, 64], strides = [1, 1]} : vector<2x256xf32> to vector<2x64xf32>
    %406 = arith.negf %405 : vector<2x64xf32>
    %407 = math.exp %406 : vector<2x64xf32>
    %cst_72 = arith.constant 1.000000e+00 : f32
    %408 = vector.broadcast %cst_72 : f32 to vector<2x64xf32>
    %409 = arith.addf %408, %407 : vector<2x64xf32>
    %410 = arith.divf %408, %409 : vector<2x64xf32>
    %411 = arith.mulf %402, %390 : vector<2x64xf32>
    %412 = arith.mulf %401, %404 : vector<2x64xf32>
    %413 = arith.addf %411, %412 : vector<2x64xf32>
    %414 = math.tanh %413 : vector<2x64xf32>
    %415 = arith.mulf %410, %414 : vector<2x64xf32>
    %cst_73 = arith.constant dense<0.000000e+00> : vector<2x256xf32>
    %416 = tpu.matmul %415, %280, %cst_73 {dimension_numbers = #tpu.dot_dimension_numbers<[1], [0], [0], [1], [0, 0, 1, 1], [], []>} : vector<2x64xf32>, vector<64x256xf32>, vector<2x256xf32> -> vector<2x256xf32>
    %417 = arith.addf %316, %416 : vector<2x256xf32>
    %418 = vector.extract_strided_slice %417 {offsets = [0, 0], sizes = [2, 128], strides = [1, 1]} : vector<2x256xf32> to vector<2x128xf32>
    %419 = arith.negf %418 : vector<2x128xf32>
    %420 = math.exp %419 : vector<2x128xf32>
    %cst_74 = arith.constant 1.000000e+00 : f32
    %421 = vector.broadcast %cst_74 : f32 to vector<2x128xf32>
    %422 = arith.addf %421, %420 : vector<2x128xf32>
    %423 = arith.divf %421, %422 : vector<2x128xf32>
    %424 = vector.extract_strided_slice %423 {offsets = [0, 0], sizes = [2, 64], strides = [1, 1]} : vector<2x128xf32> to vector<2x64xf32>
    %425 = vector.extract_strided_slice %423 {offsets = [0, 64], sizes = [2, 64], strides = [1, 1]} : vector<2x128xf32> to vector<2x64xf32>
    %426 = vector.extract_strided_slice %417 {offsets = [0, 128], sizes = [2, 64], strides = [1, 1]} : vector<2x256xf32> to vector<2x64xf32>
    %427 = math.tanh %426 : vector<2x64xf32>
    %428 = vector.extract_strided_slice %417 {offsets = [0, 192], sizes = [2, 64], strides = [1, 1]} : vector<2x256xf32> to vector<2x64xf32>
    %429 = arith.negf %428 : vector<2x64xf32>
    %430 = math.exp %429 : vector<2x64xf32>
    %cst_75 = arith.constant 1.000000e+00 : f32
    %431 = vector.broadcast %cst_75 : f32 to vector<2x64xf32>
    %432 = arith.addf %431, %430 : vector<2x64xf32>
    %433 = arith.divf %431, %432 : vector<2x64xf32>
    %434 = arith.mulf %425, %413 : vector<2x64xf32>
    %435 = arith.mulf %424, %427 : vector<2x64xf32>
    %436 = arith.addf %434, %435 : vector<2x64xf32>
    %437 = math.tanh %436 : vector<2x64xf32>
    %438 = arith.mulf %433, %437 : vector<2x64xf32>
    %cst_76 = arith.constant dense<0.000000e+00> : vector<2x256xf32>
    %439 = tpu.matmul %438, %280, %cst_76 {dimension_numbers = #tpu.dot_dimension_numbers<[1], [0], [0], [1], [0, 0, 1, 1], [], []>} : vector<2x64xf32>, vector<64x256xf32>, vector<2x256xf32> -> vector<2x256xf32>
    %440 = arith.addf %323, %439 : vector<2x256xf32>
    %441 = vector.extract_strided_slice %440 {offsets = [0, 0], sizes = [2, 128], strides = [1, 1]} : vector<2x256xf32> to vector<2x128xf32>
    %442 = arith.negf %441 : vector<2x128xf32>
    %443 = math.exp %442 : vector<2x128xf32>
    %cst_77 = arith.constant 1.000000e+00 : f32
    %444 = vector.broadcast %cst_77 : f32 to vector<2x128xf32>
    %445 = arith.addf %444, %443 : vector<2x128xf32>
    %446 = arith.divf %444, %445 : vector<2x128xf32>
    %447 = vector.extract_strided_slice %446 {offsets = [0, 0], sizes = [2, 64], strides = [1, 1]} : vector<2x128xf32> to vector<2x64xf32>
    %448 = vector.extract_strided_slice %446 {offsets = [0, 64], sizes = [2, 64], strides = [1, 1]} : vector<2x128xf32> to vector<2x64xf32>
    %449 = vector.extract_strided_slice %440 {offsets = [0, 128], sizes = [2, 64], strides = [1, 1]} : vector<2x256xf32> to vector<2x64xf32>
    %450 = math.tanh %449 : vector<2x64xf32>
    %451 = vector.extract_strided_slice %440 {offsets = [0, 192], sizes = [2, 64], strides = [1, 1]} : vector<2x256xf32> to vector<2x64xf32>
    %452 = arith.negf %451 : vector<2x64xf32>
    %453 = math.exp %452 : vector<2x64xf32>
    %cst_78 = arith.constant 1.000000e+00 : f32
    %454 = vector.broadcast %cst_78 : f32 to vector<2x64xf32>
    %455 = arith.addf %454, %453 : vector<2x64xf32>
    %456 = arith.divf %454, %455 : vector<2x64xf32>
    %457 = arith.mulf %448, %436 : vector<2x64xf32>
    %458 = arith.mulf %447, %450 : vector<2x64xf32>
    %459 = arith.addf %457, %458 : vector<2x64xf32>
    %460 = math.tanh %459 : vector<2x64xf32>
    %461 = arith.mulf %456, %460 : vector<2x64xf32>
    %cst_79 = arith.constant dense<0.000000e+00> : vector<2x256xf32>
    %462 = tpu.matmul %461, %280, %cst_79 {dimension_numbers = #tpu.dot_dimension_numbers<[1], [0], [0], [1], [0, 0, 1, 1], [], []>} : vector<2x64xf32>, vector<64x256xf32>, vector<2x256xf32> -> vector<2x256xf32>
    %463 = arith.addf %330, %462 : vector<2x256xf32>
    %464 = vector.extract_strided_slice %463 {offsets = [0, 0], sizes = [2, 128], strides = [1, 1]} : vector<2x256xf32> to vector<2x128xf32>
    %465 = arith.negf %464 : vector<2x128xf32>
    %466 = math.exp %465 : vector<2x128xf32>
    %cst_80 = arith.constant 1.000000e+00 : f32
    %467 = vector.broadcast %cst_80 : f32 to vector<2x128xf32>
    %468 = arith.addf %467, %466 : vector<2x128xf32>
    %469 = arith.divf %467, %468 : vector<2x128xf32>
    %470 = vector.extract_strided_slice %469 {offsets = [0, 0], sizes = [2, 64], strides = [1, 1]} : vector<2x128xf32> to vector<2x64xf32>
    %471 = vector.extract_strided_slice %469 {offsets = [0, 64], sizes = [2, 64], strides = [1, 1]} : vector<2x128xf32> to vector<2x64xf32>
    %472 = vector.extract_strided_slice %463 {offsets = [0, 128], sizes = [2, 64], strides = [1, 1]} : vector<2x256xf32> to vector<2x64xf32>
    %473 = math.tanh %472 : vector<2x64xf32>
    %474 = vector.extract_strided_slice %463 {offsets = [0, 192], sizes = [2, 64], strides = [1, 1]} : vector<2x256xf32> to vector<2x64xf32>
    %475 = arith.negf %474 : vector<2x64xf32>
    %476 = math.exp %475 : vector<2x64xf32>
    %cst_81 = arith.constant 1.000000e+00 : f32
    %477 = vector.broadcast %cst_81 : f32 to vector<2x64xf32>
    %478 = arith.addf %477, %476 : vector<2x64xf32>
    %479 = arith.divf %477, %478 : vector<2x64xf32>
    %480 = arith.mulf %471, %459 : vector<2x64xf32>
    %481 = arith.mulf %470, %473 : vector<2x64xf32>
    %482 = arith.addf %480, %481 : vector<2x64xf32>
    %483 = math.tanh %482 : vector<2x64xf32>
    %484 = arith.mulf %479, %483 : vector<2x64xf32>
    %cst_82 = arith.constant dense<0.000000e+00> : vector<2x256xf32>
    %485 = tpu.matmul %484, %280, %cst_82 {dimension_numbers = #tpu.dot_dimension_numbers<[1], [0], [0], [1], [0, 0, 1, 1], [], []>} : vector<2x64xf32>, vector<64x256xf32>, vector<2x256xf32> -> vector<2x256xf32>
    %486 = arith.addf %337, %485 : vector<2x256xf32>
    %487 = vector.extract_strided_slice %486 {offsets = [0, 0], sizes = [2, 128], strides = [1, 1]} : vector<2x256xf32> to vector<2x128xf32>
    %488 = arith.negf %487 : vector<2x128xf32>
    %489 = math.exp %488 : vector<2x128xf32>
    %cst_83 = arith.constant 1.000000e+00 : f32
    %490 = vector.broadcast %cst_83 : f32 to vector<2x128xf32>
    %491 = arith.addf %490, %489 : vector<2x128xf32>
    %492 = arith.divf %490, %491 : vector<2x128xf32>
    %493 = vector.extract_strided_slice %492 {offsets = [0, 0], sizes = [2, 64], strides = [1, 1]} : vector<2x128xf32> to vector<2x64xf32>
    %494 = vector.extract_strided_slice %492 {offsets = [0, 64], sizes = [2, 64], strides = [1, 1]} : vector<2x128xf32> to vector<2x64xf32>
    %495 = vector.extract_strided_slice %486 {offsets = [0, 128], sizes = [2, 64], strides = [1, 1]} : vector<2x256xf32> to vector<2x64xf32>
    %496 = math.tanh %495 : vector<2x64xf32>
    %497 = vector.extract_strided_slice %486 {offsets = [0, 192], sizes = [2, 64], strides = [1, 1]} : vector<2x256xf32> to vector<2x64xf32>
    %498 = arith.negf %497 : vector<2x64xf32>
    %499 = math.exp %498 : vector<2x64xf32>
    %cst_84 = arith.constant 1.000000e+00 : f32
    %500 = vector.broadcast %cst_84 : f32 to vector<2x64xf32>
    %501 = arith.addf %500, %499 : vector<2x64xf32>
    %502 = arith.divf %500, %501 : vector<2x64xf32>
    %503 = arith.mulf %494, %482 : vector<2x64xf32>
    %504 = arith.mulf %493, %496 : vector<2x64xf32>
    %505 = arith.addf %503, %504 : vector<2x64xf32>
    %506 = math.tanh %505 : vector<2x64xf32>
    %507 = arith.mulf %502, %506 : vector<2x64xf32>
    %cst_85 = arith.constant dense<0.000000e+00> : vector<2x256xf32>
    %508 = tpu.matmul %507, %280, %cst_85 {dimension_numbers = #tpu.dot_dimension_numbers<[1], [0], [0], [1], [0, 0, 1, 1], [], []>} : vector<2x64xf32>, vector<64x256xf32>, vector<2x256xf32> -> vector<2x256xf32>
    %509 = arith.addf %344, %508 : vector<2x256xf32>
    %510 = vector.extract_strided_slice %509 {offsets = [0, 0], sizes = [2, 128], strides = [1, 1]} : vector<2x256xf32> to vector<2x128xf32>
    %511 = arith.negf %510 : vector<2x128xf32>
    %512 = math.exp %511 : vector<2x128xf32>
    %cst_86 = arith.constant 1.000000e+00 : f32
    %513 = vector.broadcast %cst_86 : f32 to vector<2x128xf32>
    %514 = arith.addf %513, %512 : vector<2x128xf32>
    %515 = arith.divf %513, %514 : vector<2x128xf32>
    %516 = vector.extract_strided_slice %515 {offsets = [0, 0], sizes = [2, 64], strides = [1, 1]} : vector<2x128xf32> to vector<2x64xf32>
    %517 = vector.extract_strided_slice %515 {offsets = [0, 64], sizes = [2, 64], strides = [1, 1]} : vector<2x128xf32> to vector<2x64xf32>
    %518 = vector.extract_strided_slice %509 {offsets = [0, 128], sizes = [2, 64], strides = [1, 1]} : vector<2x256xf32> to vector<2x64xf32>
    %519 = math.tanh %518 : vector<2x64xf32>
    %520 = vector.extract_strided_slice %509 {offsets = [0, 192], sizes = [2, 64], strides = [1, 1]} : vector<2x256xf32> to vector<2x64xf32>
    %521 = arith.negf %520 : vector<2x64xf32>
    %522 = math.exp %521 : vector<2x64xf32>
    %cst_87 = arith.constant 1.000000e+00 : f32
    %523 = vector.broadcast %cst_87 : f32 to vector<2x64xf32>
    %524 = arith.addf %523, %522 : vector<2x64xf32>
    %525 = arith.divf %523, %524 : vector<2x64xf32>
    %526 = arith.mulf %517, %505 : vector<2x64xf32>
    %527 = arith.mulf %516, %519 : vector<2x64xf32>
    %528 = arith.addf %526, %527 : vector<2x64xf32>
    %529 = math.tanh %528 : vector<2x64xf32>
    %530 = arith.mulf %525, %529 : vector<2x64xf32>
    %531 = vector.extract_strided_slice %530 {offsets = [0, 0], sizes = [2, 32], strides = [1, 1]} : vector<2x64xf32> to vector<2x32xf32>
    %532 = arith.addf %279, %531 : vector<2x32xf32>
    %533 = vector.extract_strided_slice %530 {offsets = [0, 32], sizes = [2, 32], strides = [1, 1]} : vector<2x64xf32> to vector<2x32xf32>
    %534 = arith.addf %532, %533 : vector<2x32xf32>
    %c0_88 = arith.constant 0 : index
    %c0_89 = arith.constant 0 : index
    %c0_90 = arith.constant 0 : index
    %535 = vector.load %arg7[%c0_88, %c0_89, %c0_90] : memref<1x2x32xf32, #tpu.memory_space<vmem>>, vector<1x2x32xf32>
    %536 = vector.shape_cast %535 : vector<1x2x32xf32> to vector<2x32xf32>
    %537 = vector.shape_cast %534 : vector<2x32xf32> to vector<1x2x32xf32>
    tpu.vector_store %arg7[%c0_88, %c0_89, %c0_90], %537 {strides = array<i32>} : memref<1x2x32xf32, #tpu.memory_space<vmem>>, vector<1x2x32xf32>,
    return
  }
}

</mosaic_0001>

<bundles_post_ra>
// kernel: tpu_custom_call.1
= control target key start
LH: loop header
LB: loop body
LE: loop exit
PB: predicated region body
PF: predicated region fallthrough
CT: control target
= control target key end

     0   :  { %12 = vsyncpa [#allocation4], 0  ;;  %s4049_s0 = inlined_call_operand.hbm [shape: f32[8,2,16], index: 0, kind: input, shape index: {}]   ;;  %s4050_s1 = inlined_call_operand.hbm [shape: f32[16,512], index: 1, kind: input, shape index: {}]   ;;  %s4051_s2 = inlined_call_operand.hbm [shape: f32[64,256], index: 2, kind: input, shape index: {}]   ;;  %s4052_s3 = inlined_call_operand.vmem [shape: f32[1,256], index: 3, kind: input, shape index: {}]   ;;  %s4053_s4 = inlined_call_operand.hbm [shape: f32[64,512], index: 4, kind: input, shape index: {}]   ;;  %s4054_s5 = inlined_call_operand.hbm [shape: f32[64,256], index: 5, kind: input, shape index: {}]   ;;  %s4055_s6 = inlined_call_operand.vmem [shape: f32[1,256], index: 6, kind: input, shape index: {}]   ;;  %s4056_s7 = inlined_call_operand.hbm [shape: f32[1,2,32], index: 7, kind: output, shape index: {}]  }
   0x1   :  { %13 = vsyncpa [#allocation7], 0 }
   0x2   :  { %14 = vsyncpa [#allocation10], 0 }
   0x3   :  { %15 = vsyncpa [#allocation5], 0  ;;  %s3508_s24 = smov [#allocation6]   ;;  %s3368_s28 = scalar_lea.hbm %s4050_s1, 1024 }
   0x4   :  { %s33_s25 = sshll.u32 %s3508_s24, 4  ;;  %p3369_p0 = scmp.ne.s32.totalorder %s4050_s1, %s3368_s28  ;;  %s34_s25 = int_to_ptr.vmem [resolvable:$true] %s33_s25 }
   0x5   :  { %p3372_p1 = scmp.lt.u32.totalorder %s3368_s28, %s4050_s1 }
   0x7   :  { %p3374_p2 = pnand %p3372_p1, %p3369_p0 }
   0x9   :  { %3377 = shalt.err (!%p3374_p2)
}
   0xa   :  { %s3378_s10 = scalar_lea.vmem %s34_s25, 1024  ;;  %p3383_p4 = scmp.lt.s32.totalorder %s34_s25, %s34_s25 }
   0xb   :  { %p3379_p3 = scmp.ne.s32.totalorder %s34_s25, %s3378_s10  ;;  %p3384_p5 = scmp.lt.s32.totalorder %s3378_s10, %s3378_s10 }
   0xd   :  { %p3385_p6 = por %p3384_p5, %p3383_p4 }
   0xf   :  { %p3386_p7 = pnand %p3385_p6, %p3379_p3 }
  0x11   :  { %3389 = shalt.err (!%p3386_p7)
}
  0x12   :  { %s3509_s11 = smov 512   ;;  %s3510_s12 = smov 32  }
  0x13   :  { %39 = dma.hbm_to_vmem [thread:$0]  %s4050_s1, 1024, %s34_s25, [#allocation7], %s3509_s11, %s3509_s11, %s3510_s12  }
  0x14   :  { %s3511_s15 = smov [#allocation9]   ;;  %s3512_s17 = smov [#allocation3]  }
  0x15   :  { %s59_s16 = sshll.u32 %s3511_s15, 4  ;;  %s21_s18 = sshll.u32 %s3512_s17, 4  ;;  %s60_s16 = int_to_ptr.vmem [resolvable:$true] %s59_s16  ;;  %s22_s18 = int_to_ptr.vmem [resolvable:$true] %s21_s18 }
  0x16   :  { %s3390_s21 = scalar_lea.hbm %s4053_s4, 4096 }
  0x17   :  { %p3391_p8 = scmp.ne.s32.totalorder %s4053_s4, %s3390_s21  ;;  %p3394_p9 = scmp.lt.u32.totalorder %s3390_s21, %s4053_s4 }
  0x19   :  { %p3396_p10 = pnand %p3394_p9, %p3391_p8 }
  0x1b   :  { %3399 = shalt.err (!%p3396_p10)
}
  0x1c   :  { %s3400_s1 = scalar_lea.vmem %s60_s16, 4096  ;;  %p3405_p12 = scmp.lt.s32.totalorder %s60_s16, %s60_s16 }
  0x1d   :  { %p3401_p11 = scmp.ne.s32.totalorder %s60_s16, %s3400_s1  ;;  %p3406_p13 = scmp.lt.s32.totalorder %s3400_s1, %s3400_s1 }
  0x1f   :  { %p3407_p0 = por %p3406_p13, %p3405_p12 }
  0x21   :  { %p3408_p1 = pnand %p3407_p0, %p3401_p11 }
  0x23   :  { %3411 = shalt.err (!%p3408_p1)
}
  0x24   :  { %65 = dma.hbm_to_vmem [thread:$0]  %s4053_s4, 4096, %s60_s16, [#allocation10], %s3509_s11, %s3509_s11, %s3510_s12  }
  0x25   :  { %s3412_s30 = scalar_lea.hbm %s4049_s0, 256 }
  0x26   :  { %p3413_p2 = scmp.ne.s32.totalorder %s4049_s0, %s3412_s30  ;;  %p3416_p3 = scmp.lt.u32.totalorder %s3412_s30, %s4049_s0 }
  0x28   :  { %p3418_p4 = pnand %p3416_p3, %p3413_p2 }
  0x2a   :  { %3421 = shalt.err (!%p3418_p4)
}
  0x2b   :  { %s3422_s14 = scalar_lea.vmem %s22_s18, 256  ;;  %p3427_p6 = scmp.lt.s32.totalorder %s22_s18, %s22_s18 }
  0x2c   :  { %p3423_p5 = scmp.ne.s32.totalorder %s22_s18, %s3422_s14  ;;  %p3428_p7 = scmp.lt.s32.totalorder %s3422_s14, %s3422_s14 }
  0x2e   :  { %p3429_p8 = por %p3428_p7, %p3427_p6 }
  0x30   :  { %p3430_p9 = pnand %p3429_p8, %p3423_p5 }
  0x32   :  { %3433 = shalt.err (!%p3430_p9)
}
  0x33   :  { %s3513_s4 = smov 2   ;;  %s3514_s16 = smov [#allocation8]  }
  0x34   :  { %27 = dma.hbm_to_vmem [thread:$0]  %s4049_s0, 256, %s22_s18, [#allocation4], %s3510_s12, %s3510_s12, %s3513_s4  }
  0x35   :  { %s45_s17 = sshll.u32 %s3514_s16, 4  ;;  %s3434_s21 = scalar_lea.hbm %s4051_s2, 2048  ;;  %s46_s17 = int_to_ptr.vmem [resolvable:$true] %s45_s17 }
  0x36   :  { %p3435_p10 = scmp.ne.s32.totalorder %s4051_s2, %s3434_s21  ;;  %p3438_p11 = scmp.lt.u32.totalorder %s3434_s21, %s4051_s2 }
  0x38   :  { %p3440_p12 = pnand %p3438_p11, %p3435_p10 }
  0x3a   :  { %3443 = shalt.err (!%p3440_p12)
}
  0x3b   :  { %s3444_s1 = scalar_lea.vmem %s46_s17, 2048  ;;  %p3449_p0 = scmp.lt.s32.totalorder %s46_s17, %s46_s17 }
  0x3c   :  { %p3445_p13 = scmp.ne.s32.totalorder %s46_s17, %s3444_s1  ;;  %p3450_p1 = scmp.lt.s32.totalorder %s3444_s1, %s3444_s1 }
  0x3e   :  { %p3451_p2 = por %p3450_p1, %p3449_p0 }
  0x40   :  { %p3452_p3 = pnand %p3451_p2, %p3445_p13 }
  0x42   :  { %3455 = shalt.err (!%p3452_p3)
}
  0x43   :  { %s3515_s0 = smov 256   ;;  %s3516_s12 = smov 16  }
  0x44   :  { %51 = dma.hbm_to_vmem [thread:$0]  %s4051_s2, 2048, %s46_s17, [#allocation7], %s3515_s0, %s3515_s0, %s3516_s12  }
  0x45   :  { %s3517_s27 = smov [#allocation11]   ;;  %s3456_s8 = scalar_lea.hbm %s4054_s5, 2048 }
  0x46   :  { %s71_s28 = sshll.u32 %s3517_s27, 4  ;;  %p3457_p4 = scmp.ne.s32.totalorder %s4054_s5, %s3456_s8  ;;  %s72_s28 = int_to_ptr.vmem [resolvable:$true] %s71_s28 }
  0x47   :  { %p3460_p5 = scmp.lt.u32.totalorder %s3456_s8, %s4054_s5 }
  0x49   :  { %p3462_p6 = pnand %p3460_p5, %p3457_p4 }
  0x4b   :  { %3465 = shalt.err (!%p3462_p6)
}
  0x4c   :  { %s3466_s4 = scalar_lea.vmem %s72_s28, 2048  ;;  %p3471_p8 = scmp.lt.s32.totalorder %s72_s28, %s72_s28 }
  0x4d   :  { %p3467_p7 = scmp.ne.s32.totalorder %s72_s28, %s3466_s4  ;;  %p3472_p9 = scmp.lt.s32.totalorder %s3466_s4, %s3466_s4 }
  0x4f   :  { %p3473_p10 = por %p3472_p9, %p3471_p8 }
  0x51   :  { %p3474_p11 = pnand %p3473_p10, %p3467_p7 }
  0x53   :  { %3477 = shalt.err (!%p3474_p11)
}
  0x54   :  { %77 = dma.hbm_to_vmem [thread:$0]  %s4054_s5, 2048, %s72_s28, [#allocation10], %s3515_s0, %s3515_s0, %s3516_s12  }
  0x55   :  { %3500 = dma.done.wait [#allocation4], 256  }
  0x56   :  { %3501 = vsyncadd [#allocation4], 4294967040 }
  0x57   :  { %3502 = dma.done.wait [#allocation7], 3072  }
  0x58   :  { %3503 = vsyncadd [#allocation7], 4294964224 }
  0x59   :  { %3504 = dma.done.wait [#allocation10], 6144  }
  0x5a   :  { %3505 = vsyncadd [#allocation10], 4294961152  ;;  %v3518_v0 = vmov 0.0   ;;  %v3519_v1 = vmov 1983009808   ;;  %v141_v3 = vlaneseq  ;;  %v121_v6 = vld [vmem:[#allocation6 + $0x8] sm:$0xff] }
  0x5b   :  { %239 = vmatprep.mubr.f32.mxu0 %v3518_v0  ;;  %316 = vmatprep.mubr.f32.mxu1 %v3518_v0  ;;  %v139_v2 = vunpack.c.l.s4 %v3519_v1  ;;  %v125_v7 = vld [vmem:[#allocation6 + $0x28] sm:$0xff]  ;;  %v123_v8 = vld [vmem:[#allocation6 + $0x18] sm:$0xff]  ;;  %v120_v11 = vld [vmem:[#allocation6] sm:$0xff]  ;;  %vm170_vm0 = vcmask 130048   ;;  %vm587_vm1 = vcmask 517120   ;;  %vm467_vm2 = vcmask 523264  }
  0x5c   :  { %v3629_v5 = vshrl.u32 %v141_v3, 7  ;;  %v2865_v9 = vpack.c.bf16 %v125_v7, %v121_v6  ;;  %v127_v10 = vld [vmem:[#allocation6 + $0x38] sm:$0xff]  ;;  %v124_v12 = vld [vmem:[#allocation6 + $0x20] sm:$0xff]  ;;  %v122_v15 = vld [vmem:[#allocation6 + $0x10] sm:$0xff]  ;;  %s3522_s19 = smov [#allocation12]   ;;  %vm2792_vm3 = vcmask 254976  }
  0x5d   :  { %v140_v4 = vunpack.c.0.s8 %v139_v2  ;;  %v2869_v13 = vpack.c.bf16 %v127_v10, %v123_v8  ;;  %v2867_v14 = vpack.c.bf16 %v124_v12, %v120_v11  ;;  %v126_v16 = vld [vmem:[#allocation6 + $0x30] sm:$0xff]  ;;  %v96_v25 = vld [vmem:[#allocation8 + $0x8] sm:$0xff]  ;;  %v98_v26 = vld [vmem:[#allocation8 + $0x18] sm:$0xff]  ;;  %s2800_s20 = sshll.u32 %s3522_s19, 4  ;;  %s2801_s20 = int_to_ptr.vmem [resolvable:$true] %s2800_s20 }
  0x5e   :  { %v112_v17 = vld [vmem:[#allocation3] sm:$0x3]  ;;  %2866 = vmatprep.subr.bf16.mxu0 %v2865_v9  ;;  %v2871_v19 = vpack.c.bf16 %v126_v16, %v122_v15  ;;  %v113_v20 = vld [vmem:[#allocation3 + $0x2] sm:$0x3]  ;;  %v114_v21 = vld [vmem:[#allocation3 + $0x4] sm:$0x3]  ;;  %v3634_v28 = vpack.c.bf16 %v98_v26, %v96_v25  ;;  %p3483_p13 = scmp.lt.s32.totalorder %s2801_s20, %s2801_s20 }
  0x5f   :  { %v3632_v18 = vsub.s32 %v140_v4, %v3629_v5  ;;  %v115_v22 = vld [vmem:[#allocation3 + $0x6] sm:$0x3]  ;;  %2870 = vmatprep.subr.bf16.mxu1 %v2869_v13  ;;  %2868 = vmatpush1.bf16.msra.mxu0 %v2867_v14  ;;  %v136_v23 = vcombine.low %v112_v17, %v113_v20  ;;  %v95_v27 = vld [vmem:[#allocation8] sm:$0xff]  ;;  %v116_v30 = vld [vmem:[#allocation3 + $0x8] sm:$0x3]  ;;  %v423_v61 = vsub.s32 0, %v3629_v5 }
  0x60   :  { %v137_v24 = vcombine.low %v114_v21, %v115_v22  ;;  %2872 = vmatpush1.bf16.msra.mxu1 %v2871_v19  ;;  %v97_v29 = vld [vmem:[#allocation8 + $0x10] sm:$0xff]  ;;  %v117_v31 = vld [vmem:[#allocation3 + $0xa] sm:$0x3]  ;;  %v118_v34 = vld [vmem:[#allocation3 + $0xc] sm:$0x3]  ;;  %2874 = vmatprep.subr.bf16.mxu0 %v3634_v28  ;;  %v427_v62 = vsub.s32 1, %v3629_v5 }
  0x61   :  { %v144_v32 = vrot.slane %v136_v23, %v3632_v18  ;;  %v119_v35 = vld [vmem:[#allocation3 + $0xe] sm:$0x3]  ;;  %v153_v36 = vcombine.low %v116_v30, %v117_v31  ;;  %v100_v37 = vld [vmem:[#allocation8 + $0x28] sm:$0xff]  ;;  %v3639_v38 = vpack.c.bf16 %v97_v29, %v95_v27  ;;  %2890 = vmatprep.subr.bf16.mxu1 %v3634_v28  ;;  %v99_v44 = vld [vmem:[#allocation8 + $0x20] sm:$0xff]  ;;  %s3478_s21 = scalar_lea.vmem %s2801_s20, 32 }
  0x62   :  { %v151_v33 = vrot.slane %v137_v24, %v3632_v18  ;;  %v154_v39 = vcombine.low %v118_v34, %v119_v35  ;;  %v102_v40 = vld [vmem:[#allocation8 + $0x38] sm:$0xff]  ;;  %v101_v45 = vld [vmem:[#allocation8 + $0x30] sm:$0xff]  ;;  %v104_v47 = vld [vmem:[#allocation8 + $0x48] sm:$0xff]  ;;  %p3479_p12 = scmp.ne.s32.totalorder %s2801_s20, %s3478_s21  ;;  %p3484_p0 = scmp.lt.s32.totalorder %s3478_s21, %s3478_s21 }
  0x63   :  { %v161_v42 = vrot.slane %v153_v36, %v3632_v18  ;;  %v3643_v43 = vpack.c.bf16 %v102_v40, %v100_v37  ;;  %v106_v48 = vld [vmem:[#allocation8 + $0x58] sm:$0xff]  ;;  %v3650_v50 = vpack.c.bf16 %v101_v45, %v99_v44  ;;  %v103_v52 = vld [vmem:[#allocation8 + $0x40] sm:$0xff]  ;;  %v105_v53 = vld [vmem:[#allocation8 + $0x50] sm:$0xff] }
  0x64   :  { %v152_v41 = vcombine.low %v144_v32, %v151_v33  ;;  %v168_v46 = vrot.slane %v154_v39, %v3632_v18  ;;  %v3654_v51 = vpack.c.bf16 %v106_v48, %v104_v47  ;;  %v108_v54 = vld [vmem:[#allocation8 + $0x68] sm:$0xff]  ;;  %v110_v55 = vld [vmem:[#allocation8 + $0x78] sm:$0xff]  ;;  %v3660_v56 = vpack.c.bf16 %v105_v53, %v103_v52  ;;  %v107_v58 = vld [vmem:[#allocation8 + $0x60] sm:$0xff]  ;;  %p3485_p1 = por %p3484_p0, %p3483_p13 }
  0x65   :  { %v3664_v57 = vpack.c.bf16 %v110_v55, %v108_v54  ;;  %v109_v59 = vld [vmem:[#allocation8 + $0x70] sm:$0xff]  ;;  %v111_v63 = vld [vmem:[%s4052_s3] sm:$0x3]  ;;  %s3520_s3 = smov 64  }
  0x66   :  { %2811 = vmatmul.mubr.msk.f32.vlgmr.msra.gmra.mrb[0].mxu0 %vm170_vm0, %v152_v41  ;;  %2813 = vmatmul.mubr.msk.f32.vlgmr.msra.gmra.mrb[0].mxu1 %vm170_vm0, %v152_v41  ;;  %v169_v49 = vcombine.low %v161_v42, %v168_v46  ;;  %v3671_v60 = vpack.c.bf16 %v109_v59, %v107_v58  ;;  %v424_v6 = vrot.slane %v111_v63, %v423_v61  ;;  %p3486_p2 = pnand %p3485_p1, %p3479_p12 }
  0x67   :  { %2876 = vmatpush1.bf16.msra.mxu0 %v3639_v38  ;;  %245 = vmatprep.mubr.f32.mxu0 %v3518_v0  ;;  %v428_v7 = vrot.slane %v111_v63, %v427_v62 }
  0x68   :  { %322 = vmatprep.mubr.f32.mxu1 %v3518_v0  ;;  %2878 = vmatprep.subr.bf16.mxu0 %v3643_v43 }
  0x69   :  { %2892 = vmatpush1.bf16.msra.mxu1 %v3639_v38  ;;  %v429_v21 = vcombine.low %v424_v6, %v428_v7 }
  0x6a   :  { %2812 = vmatmul.mubr.msk.f32.gmra.mrb[2].mxu0 %vm170_vm0, %v169_v49  ;;  %2814 = vmatmul.mubr.msk.f32.gmra.mrb[2].mxu1 %vm170_vm0, %v169_v49 }
  0x6b   :  { %2880 = vmatpush1.bf16.msra.mxu0 %v3650_v50  ;;  %535 = vmatprep.mubr.f32.mxu0 %v3518_v0  ;;  %v436_v35 = vrot.slane %v429_v21, %v3632_v18 }
  0x6c   :  { %2882 = vmatprep.subr.bf16.mxu0 %v3654_v51  ;;  %2894 = vmatprep.subr.bf16.mxu1 %v3643_v43 }
  0x6d   :  { %2896 = vmatpush1.bf16.msra.mxu1 %v3650_v50  ;;  %656 = vmatprep.mubr.f32.mxu1 %v3518_v0 }
  0x6e   :  { %2898 = vmatprep.subr.bf16.mxu1 %v3654_v51 }
  0x6f   :  { %2884 = vmatpush1.bf16.msra.mxu0 %v3660_v56 }
  0x70   :  { %2886 = vmatprep.subr.bf16.mxu0 %v3664_v57 }
  0x71   :  { %2900 = vmatpush1.bf16.msra.mxu1 %v3660_v56 }
  0x72   :  { %2902 = vmatprep.subr.bf16.mxu1 %v3664_v57 }
  0x73   :  { %2888 = vmatpush1.bf16.msra.mxu0 %v3671_v60 }
  0x74   :  { %2906 = vmatprep.subr.bf16.mxu0 %v3634_v28 }
  0x75   :  { %2904 = vmatpush1.bf16.msra.mxu1 %v3671_v60 }
  0x76   :  { %536 = vmatmul.mubr.f32.vlgmr.msra.gmra.mrb[4].mxu0 %v3518_v0  ;;  %2922 = vmatprep.subr.bf16.mxu1 %v3634_v28 }
  0x77   :  { %2908 = vmatpush1.bf16.msra.mxu0 %v3639_v38  ;;  %777 = vmatprep.mubr.f32.mxu0 %v3518_v0 }
  0x78   :  { %2910 = vmatprep.subr.bf16.mxu0 %v3643_v43 }
  0x7b   :  { %2912 = vmatpush1.bf16.msra.mxu0 %v3650_v50 }
  0x7c   :  { %2914 = vmatprep.subr.bf16.mxu0 %v3654_v51 }
  0x7f   :  { %2916 = vmatpush1.bf16.msra.mxu0 %v3660_v56 }
  0x80   :  { %2918 = vmatprep.subr.bf16.mxu0 %v3664_v57 }
  0x83   :  { %2920 = vmatpush1.bf16.msra.mxu0 %v3671_v60 }
  0x84   :  { %2938 = vmatprep.subr.bf16.mxu0 %v3634_v28 }
 0x139   :  { %v241_v1 = vpop.f32.mrb[0].mxu0  ;;  %v318_v2 = vpop.f32.mrb[0].mxu1 }
 0x13a   :  { %v243_v3 = vpop.f32.mrb[1].mxu0  ;;  %v320_v4 = vpop.f32.mrb[1].mxu1 }
 0x13b   :  { %v337_v8 = vcombine.low %v241_v1, %v243_v3  ;;  %v338_v9 = vcombine.high %v241_v1, %v243_v3  ;;  %v339_v10 = vcombine.low %v318_v2, %v320_v4  ;;  %v340_v11 = vcombine.high %v318_v2, %v320_v4 }
 0x13d   :  { %v347_v12 = vrot.slane %v337_v8, %v3632_v18  ;;  %v354_v13 = vrot.slane %v338_v9, %v3632_v18  ;;  %v361_v14 = vrot.slane %v339_v10, %v3632_v18  ;;  %v368_v15 = vrot.slane %v340_v11, %v3632_v18  ;;  %v247_v16 = vpop.f32.mrb[2].mxu0  ;;  %v324_v17 = vpop.f32.mrb[2].mxu1 }
 0x13e   :  { %v249_v19 = vpop.f32.mrb[3].mxu0  ;;  %v326_v20 = vpop.f32.mrb[3].mxu1 }
 0x13f   :  { %v369_v22 = vcombine.low %v347_v12, %v361_v14  ;;  %v370_v23 = vcombine.high %v347_v12, %v361_v14  ;;  %v371_v24 = vcombine.low %v354_v13, %v368_v15  ;;  %v372_v25 = vcombine.high %v354_v13, %v368_v15 }
 0x140   :  { %v373_v26 = vcombine.low %v247_v16, %v249_v19  ;;  %v374_v27 = vcombine.high %v247_v16, %v249_v19  ;;  %v375_v29 = vcombine.low %v324_v17, %v326_v20  ;;  %v376_v30 = vcombine.high %v324_v17, %v326_v20 }
 0x141   :  { %v451_v41 = vrot.slane %v372_v25, 4  ;;  %v455_v42 = vrot.slane %v371_v24, 4  ;;  %v459_v44 = vrot.slane %v370_v23, 4  ;;  %v463_v45 = vrot.slane %v369_v22, 4 }
 0x142   :  { %v383_v31 = vrot.slane %v373_v26, %v3632_v18  ;;  %v390_v32 = vrot.slane %v374_v27, %v3632_v18  ;;  %v397_v33 = vrot.slane %v375_v29, %v3632_v18  ;;  %v404_v34 = vrot.slane %v376_v30, %v3632_v18 }
 0x144   :  { %v405_v36 = vcombine.low %v383_v31, %v397_v33  ;;  %v406_v37 = vcombine.high %v383_v31, %v397_v33  ;;  %v407_v39 = vcombine.low %v390_v32, %v404_v34  ;;  %v408_v40 = vcombine.high %v390_v32, %v404_v34 }
 0x146   :  { %v417_v46 = vrot.slane %v408_v40, 4  ;;  %v439_v47 = vrot.slane %v407_v39, 4  ;;  %v443_v48 = vrot.slane %v406_v37, 4  ;;  %v447_v49 = vrot.slane %v405_v36, 4 }
 0x147   :  { %v453_v52 = vadd.f32 %v451_v41, %v405_v36  ;;  %v457_v53 = vadd.f32 %v455_v42, %v406_v37  ;;  %v461_v54 = vadd.f32 %v459_v44, %v407_v39  ;;  %v465_v55 = vadd.f32 %v463_v45, %v408_v40 }
 0x148   :  { %v419_v58 = vadd.f32 %v417_v46, %v369_v22  ;;  %v441_v59 = vadd.f32 %v439_v47, %v370_v23  ;;  %v445_v63 = vadd.f32 %v443_v48, %v371_v24  ;;  %v449_v1 = vadd.f32 %v447_v49, %v372_v25 }
 0x149   :  { %v537_v2 = vpop.f32.mrb[4].mxu0  ;;  %v3708_v3 = vadd.f32 %v453_v52, %v436_v35  ;;  %v3710_v4 = vadd.f32 %v457_v53, %v436_v35  ;;  %v3712_v6 = vadd.f32 %v461_v54, %v436_v35  ;;  %v3714_v7 = vadd.f32 %v465_v55, %v436_v35 }
 0x14a   :  { %v539_v8 = vpop.f32.mrb[5].mxu0  ;;  %v442_v9 = vadd.f32 %v441_v59, %v436_v35  ;;  %v3716_v10 = vadd.f32 %v445_v63, %v436_v35  ;;  %v3718_v11 = vadd.f32 %v449_v1, %v436_v35  ;;  %v438_v13 = vadd.f32 %v436_v35, %v419_v58 }
 0x14b   :  { %v544_v12 = vcombine.low %v537_v2, %v539_v8 }
 0x14d   :  { %v551_v14 = vrot.slane %v544_v12, %v3632_v18 }
 0x14f   :  { %v553_v15 = vadd.f32 %v551_v14, %v438_v13 }
 0x151   :  { %v2815_v16 = vmul.f32 -1.442695, %v553_v15  ;;  %v561_v17 = vrot.slane %v553_v15, 2 }
 0x153   :  { %3176 = vpow2.f32 %v2815_v16 }
 0x154   :  { %3178 = vtanh.f32 %v561_v17 }
 0x15d   :  { %v3177_v19 = vpop.eup %3176 }
 0x15e   :  { %v557_v20 = vadd.f32 1.0, %v3177_v19  ;;  %v3179_v21 = vpop.eup %3178 }
 0x160   :  { %3180 = vrcp.f32 %v557_v20 }
 0x16a   :  { %v3181_v22 = vpop.eup %3180 }
 0x16b   :  { %v575_v23 = vmul.f32 %v3181_v22, %v3179_v21  ;;  %v574_v24 = vmul.f32 0.0, %v3181_v22 }
 0x16d   :  { %577 = vrot.lane.b32.xlu0 %v575_v23, %s3520_s3 }
 0x171   :  { %564 = vrot.lane.b32.xlu0 %v553_v15, %s3520_s3 }
 0x1df   :  { %v578_v25 = vpop.permute.xlu0 %577 }
 0x1e0   :  { %v580_v26 = vadd.f32 %v578_v25, %v574_v24 }
 0x1e2   :  { %3182 = vtanh.f32 %v580_v26 }
 0x1e3   :  { %v565_v29 = vpop.permute.xlu0 %564 }
 0x1e4   :  { %v566_v30 = vrot.slane %v565_v29, 2 }
 0x1e6   :  { %v2816_v31 = vmul.f32 -1.442695, %v566_v30 }
 0x1e8   :  { %3184 = vpow2.f32 %v2816_v31 }
 0x1ec   :  { %v3183_v27 = vpop.eup %3182 }
 0x1ed   :  { %583 = vrot.lane.b32.xlu1 %v3183_v27, %s3520_s3 }
 0x1f2   :  { %v3185_v32 = vpop.eup %3184 }
 0x1f3   :  { %v571_v33 = vadd.f32 1.0, %v3185_v32 }
 0x1f5   :  { %3186 = vrcp.f32 %v571_v33 }
 0x1ff   :  { %v3187_v34 = vpop.eup %3186 }
 0x25f   :  { %v584_v35 = vpop.permute.xlu1 %583 }
 0x260   :  { %v586_v36 = vmul.f32 %v3187_v34, %v584_v35 }
 0x262   :  { %588 = vst.msk [vmem:[#allocation2] sm:$0x3] %vm587_vm1, %v586_v36  ;;  %2817 = vmatmul.mubr.msk.f32.vlgmr.msra.gmra.mrb[4].mxu1 %vm467_vm2, %v586_v36 }
 0x263   :  { %2924 = vmatpush1.bf16.msra.mxu1 %v3639_v38  ;;  %898 = vmatprep.mubr.f32.mxu1 %v3518_v0 }
 0x264   :  { %2926 = vmatprep.subr.bf16.mxu1 %v3643_v43 }
 0x267   :  { %2928 = vmatpush1.bf16.msra.mxu1 %v3650_v50 }
 0x268   :  { %2930 = vmatprep.subr.bf16.mxu1 %v3654_v51 }
 0x26b   :  { %2932 = vmatpush1.bf16.msra.mxu1 %v3660_v56 }
 0x26c   :  { %2934 = vmatprep.subr.bf16.mxu1 %v3664_v57 }
 0x26f   :  { %2936 = vmatpush1.bf16.msra.mxu1 %v3671_v60 }
 0x270   :  { %2954 = vmatprep.subr.bf16.mxu1 %v3634_v28 }
 0x335   :  { %v658_v37 = vpop.f32.mrb[4].mxu1 }
 0x336   :  { %v660_v39 = vpop.f32.mrb[5].mxu1 }
 0x337   :  { %v665_v40 = vcombine.low %v658_v37, %v660_v39 }
 0x339   :  { %v672_v41 = vrot.slane %v665_v40, %v3632_v18 }
 0x33b   :  { %v674_v42 = vadd.f32 %v672_v41, %v442_v9 }
 0x33d   :  { %685 = vrot.lane.b32.xlu0 %v674_v42, %s3520_s3  ;;  %v2818_v44 = vmul.f32 -1.442695, %v674_v42  ;;  %v682_v45 = vrot.slane %v674_v42, 2 }
 0x33f   :  { %3188 = vpow2.f32 %v2818_v44 }
 0x340   :  { %3190 = vtanh.f32 %v682_v45 }
 0x349   :  { %v3189_v46 = vpop.eup %3188 }
 0x34a   :  { %v678_v47 = vadd.f32 1.0, %v3189_v46  ;;  %v3191_v48 = vpop.eup %3190 }
 0x34c   :  { %3192 = vrcp.f32 %v678_v47 }
 0x356   :  { %v3193_v49 = vpop.eup %3192 }
 0x357   :  { %v696_v52 = vmul.f32 %v3193_v49, %v3191_v48  ;;  %v695_v53 = vmul.f32 %v3193_v49, %v580_v26 }
 0x359   :  { %698 = vrot.lane.b32.xlu1 %v696_v52, %s3520_s3 }
 0x3af   :  { %v686_v59 = vpop.permute.xlu0 %685 }
 0x3b0   :  { %v687_v63 = vrot.slane %v686_v59, 2 }
 0x3b2   :  { %v2819_v1 = vmul.f32 -1.442695, %v687_v63 }
 0x3cb   :  { %v699_v54 = vpop.permute.xlu1 %698 }
 0x3cc   :  { %v701_v55 = vadd.f32 %v699_v54, %v695_v53 }
 0x3ce   :  { %3194 = vtanh.f32 %v701_v55 }
 0x3cf   :  { %3196 = vpow2.f32 %v2819_v1 }
 0x3d8   :  { %v3195_v58 = vpop.eup %3194 }
 0x3d9   :  { %704 = vrot.lane.b32.xlu1 %v3195_v58, %s3520_s3  ;;  %v3197_v2 = vpop.eup %3196 }
 0x3da   :  { %v692_v8 = vadd.f32 1.0, %v3197_v2 }
 0x3dc   :  { %3198 = vrcp.f32 %v692_v8 }
 0x3e6   :  { %v3199_v9 = vpop.eup %3198 }
 0x44b   :  { %v705_v12 = vpop.permute.xlu1 %704 }
 0x44c   :  { %v707_v13 = vmul.f32 %v3199_v9, %v705_v12 }
 0x44e   :  { %709 = vst.msk [vmem:[#allocation2 + $0x2] sm:$0x3] %vm587_vm1, %v707_v13  ;;  %2820 = vmatmul.mubr.msk.f32.vlgmr.msra.gmra.mrb[6].mxu0 %vm467_vm2, %v707_v13 }
 0x44f   :  { %2940 = vmatpush1.bf16.msra.mxu0 %v3639_v38  ;;  %1019 = vmatprep.mubr.f32.mxu0 %v3518_v0 }
 0x450   :  { %2942 = vmatprep.subr.bf16.mxu0 %v3643_v43 }
 0x453   :  { %2944 = vmatpush1.bf16.msra.mxu0 %v3650_v50 }
 0x454   :  { %2946 = vmatprep.subr.bf16.mxu0 %v3654_v51 }
 0x457   :  { %2948 = vmatpush1.bf16.msra.mxu0 %v3660_v56 }
 0x458   :  { %2950 = vmatprep.subr.bf16.mxu0 %v3664_v57 }
 0x45b   :  { %2952 = vmatpush1.bf16.msra.mxu0 %v3671_v60 }
 0x45c   :  { %2970 = vmatprep.subr.bf16.mxu0 %v3634_v28 }
 0x521   :  { %v779_v14 = vpop.f32.mrb[6].mxu0 }
 0x522   :  { %v781_v15 = vpop.f32.mrb[7].mxu0 }
 0x523   :  { %v786_v16 = vcombine.low %v779_v14, %v781_v15 }
 0x525   :  { %v793_v17 = vrot.slane %v786_v16, %v3632_v18 }
 0x527   :  { %v795_v19 = vadd.f32 %v793_v17, %v3716_v10 }
 0x529   :  { %806 = vrot.lane.b32.xlu1 %v795_v19, %s3520_s3  ;;  %v2821_v20 = vmul.f32 -1.442695, %v795_v19  ;;  %v803_v21 = vrot.slane %v795_v19, 2 }
 0x52b   :  { %3200 = vpow2.f32 %v2821_v20 }
 0x52c   :  { %3202 = vtanh.f32 %v803_v21 }
 0x535   :  { %v3201_v22 = vpop.eup %3200 }
 0x536   :  { %v799_v23 = vadd.f32 1.0, %v3201_v22  ;;  %v3203_v24 = vpop.eup %3202 }
 0x538   :  { %3204 = vrcp.f32 %v799_v23 }
 0x542   :  { %v3205_v25 = vpop.eup %3204 }
 0x543   :  { %v817_v26 = vmul.f32 %v3205_v25, %v3203_v24  ;;  %v816_v27 = vmul.f32 %v3205_v25, %v701_v55 }
 0x545   :  { %819 = vrot.lane.b32.xlu0 %v817_v26, %s3520_s3 }
 0x59b   :  { %v807_v10 = vpop.permute.xlu1 %806 }
 0x59c   :  { %v808_v32 = vrot.slane %v807_v10, 2 }
 0x59e   :  { %v2822_v33 = vmul.f32 -1.442695, %v808_v32 }
 0x5b7   :  { %v820_v29 = vpop.permute.xlu0 %819 }
 0x5b8   :  { %v822_v30 = vadd.f32 %v820_v29, %v816_v27 }
 0x5ba   :  { %3206 = vtanh.f32 %v822_v30 }
 0x5bb   :  { %3208 = vpow2.f32 %v2822_v33 }
 0x5c4   :  { %v3207_v31 = vpop.eup %3206 }
 0x5c5   :  { %825 = vrot.lane.b32.xlu0 %v3207_v31, %s3520_s3  ;;  %v3209_v34 = vpop.eup %3208 }
 0x5c6   :  { %v813_v35 = vadd.f32 1.0, %v3209_v34 }
 0x5c8   :  { %3210 = vrcp.f32 %v813_v35 }
 0x5d2   :  { %v3211_v36 = vpop.eup %3210 }
 0x637   :  { %v826_v37 = vpop.permute.xlu0 %825 }
 0x638   :  { %v828_v39 = vmul.f32 %v3211_v36, %v826_v37 }
 0x63a   :  { %830 = vst.msk [vmem:[#allocation2 + $0x4] sm:$0x3] %vm587_vm1, %v828_v39  ;;  %2823 = vmatmul.mubr.msk.f32.vlgmr.msra.gmra.mrb[6].mxu1 %vm467_vm2, %v828_v39 }
 0x63b   :  { %2956 = vmatpush1.bf16.msra.mxu1 %v3639_v38  ;;  %1140 = vmatprep.mubr.f32.mxu1 %v3518_v0 }
 0x63c   :  { %2958 = vmatprep.subr.bf16.mxu1 %v3643_v43 }
 0x63f   :  { %2960 = vmatpush1.bf16.msra.mxu1 %v3650_v50 }
 0x640   :  { %2962 = vmatprep.subr.bf16.mxu1 %v3654_v51 }
 0x643   :  { %2964 = vmatpush1.bf16.msra.mxu1 %v3660_v56 }
 0x644   :  { %2966 = vmatprep.subr.bf16.mxu1 %v3664_v57 }
 0x647   :  { %2968 = vmatpush1.bf16.msra.mxu1 %v3671_v60 }
 0x648   :  { %2986 = vmatprep.subr.bf16.mxu1 %v3634_v28 }
 0x70d   :  { %v900_v40 = vpop.f32.mrb[6].mxu1 }
 0x70e   :  { %v902_v41 = vpop.f32.mrb[7].mxu1 }
 0x70f   :  { %v907_v42 = vcombine.low %v900_v40, %v902_v41 }
 0x711   :  { %v914_v44 = vrot.slane %v907_v42, %v3632_v18 }
 0x713   :  { %v916_v45 = vadd.f32 %v914_v44, %v3718_v11 }
 0x715   :  { %927 = vrot.lane.b32.xlu0 %v916_v45, %s3520_s3  ;;  %v2824_v46 = vmul.f32 -1.442695, %v916_v45  ;;  %v924_v47 = vrot.slane %v916_v45, 2 }
 0x717   :  { %3212 = vpow2.f32 %v2824_v46 }
 0x718   :  { %3214 = vtanh.f32 %v924_v47 }
 0x721   :  { %v3213_v48 = vpop.eup %3212 }
 0x722   :  { %v920_v49 = vadd.f32 1.0, %v3213_v48  ;;  %v3215_v52 = vpop.eup %3214  ;;  %v1468_v48 = vld [vmem:[#allocation9 + $0x8] sm:$0xff] }
 0x724   :  { %3216 = vrcp.f32 %v920_v49 }
 0x72e   :  { %v3217_v53 = vpop.eup %3216 }
 0x72f   :  { %v938_v54 = vmul.f32 %v3217_v53, %v3215_v52  ;;  %v937_v28 = vmul.f32 %v3217_v53, %v822_v30 }
 0x731   :  { %940 = vrot.lane.b32.xlu1 %v938_v54, %s3520_s3 }
 0x787   :  { %v928_v11 = vpop.permute.xlu0 %927 }
 0x788   :  { %v929_v63 = vrot.slane %v928_v11, 2  ;;  %v1471_v11 = vld [vmem:[#allocation9 + $0x20] sm:$0xff] }
 0x78a   :  { %v2825_v1 = vmul.f32 -1.442695, %v929_v63  ;;  %v1476_v63 = vld [vmem:[#allocation9 + $0x48] sm:$0xff] }
 0x7a3   :  { %v941_v55 = vpop.permute.xlu1 %940 }
 0x7a4   :  { %v943_v58 = vadd.f32 %v941_v55, %v937_v28 }
 0x7a6   :  { %3218 = vtanh.f32 %v943_v58 }
 0x7a7   :  { %3220 = vpow2.f32 %v2825_v1  ;;  %v1480_v1 = vld [vmem:[#allocation9 + $0x68] sm:$0xff] }
 0x7b0   :  { %v3219_v59 = vpop.eup %3218 }
 0x7b1   :  { %946 = vrot.lane.b32.xlu1 %v3219_v59, %s3520_s3  ;;  %v3221_v2 = vpop.eup %3220  ;;  %v1467_v59 = vld [vmem:[#allocation9] sm:$0xff] }
 0x7b2   :  { %v934_v8 = vadd.f32 1.0, %v3221_v2 }
 0x7b4   :  { %3222 = vrcp.f32 %v934_v8 }
 0x7be   :  { %v3223_v9 = vpop.eup %3222 }
 0x823   :  { %v947_v12 = vpop.permute.xlu1 %946 }
 0x824   :  { %v949_v13 = vmul.f32 %v3223_v9, %v947_v12  ;;  %v3003_v9 = vpack.c.bf16 %v1471_v11, %v1467_v59 }
 0x826   :  { %951 = vst.msk [vmem:[#allocation2 + $0x6] sm:$0x3] %vm587_vm1, %v949_v13  ;;  %2826 = vmatmul.mubr.msk.f32.vlgmr.msra.gmra.mrb[8].mxu0 %vm467_vm2, %v949_v13  ;;  %v3005_v13 = vpack.c.bf16 %v1480_v1, %v1476_v63 }
 0x827   :  { %2972 = vmatpush1.bf16.msra.mxu0 %v3639_v38  ;;  %1261 = vmatprep.mubr.f32.mxu0 %v3518_v0 }
 0x828   :  { %2974 = vmatprep.subr.bf16.mxu0 %v3643_v43 }
 0x82b   :  { %2976 = vmatpush1.bf16.msra.mxu0 %v3650_v50 }
 0x82c   :  { %2978 = vmatprep.subr.bf16.mxu0 %v3654_v51 }
 0x82f   :  { %2980 = vmatpush1.bf16.msra.mxu0 %v3660_v56 }
 0x830   :  { %2982 = vmatprep.subr.bf16.mxu0 %v3664_v57 }
 0x833   :  { %2984 = vmatpush1.bf16.msra.mxu0 %v3671_v60 }
 0x8f9   :  { %v1021_v14 = vpop.f32.mrb[8].mxu0 }
 0x8fa   :  { %v1023_v15 = vpop.f32.mrb[9].mxu0 }
 0x8fb   :  { %v1028_v16 = vcombine.low %v1021_v14, %v1023_v15  ;;  %v1475_v14 = vld [vmem:[#allocation9 + $0x40] sm:$0xff] }
 0x8fc   :  { %v1479_v15 = vld [vmem:[#allocation9 + $0x60] sm:$0xff] }
 0x8fd   :  { %v1035_v17 = vrot.slane %v1028_v16, %v3632_v18  ;;  %v1484_v16 = vld [vmem:[#allocation9 + $0x88] sm:$0xff] }
 0x8ff   :  { %v1037_v19 = vadd.f32 %v1035_v17, %v3708_v3  ;;  %v1488_v17 = vld [vmem:[#allocation9 + $0xa8] sm:$0xff] }
 0x901   :  { %1048 = vrot.lane.b32.xlu1 %v1037_v19, %s3520_s3  ;;  %v2827_v20 = vmul.f32 -1.442695, %v1037_v19  ;;  %v1045_v21 = vrot.slane %v1037_v19, 2  ;;  %v3007_v19 = vpack.c.bf16 %v1479_v15, %v1475_v14 }
 0x903   :  { %3224 = vpow2.f32 %v2827_v20  ;;  %v3009_v20 = vpack.c.bf16 %v1488_v17, %v1484_v16  ;;  %v1477_v17 = vld [vmem:[#allocation9 + $0x50] sm:$0xff] }
 0x904   :  { %3226 = vtanh.f32 %v1045_v21  ;;  %v1483_v21 = vld [vmem:[#allocation9 + $0x80] sm:$0xff] }
 0x90d   :  { %v3225_v22 = vpop.eup %3224 }
 0x90e   :  { %v1041_v23 = vadd.f32 1.0, %v3225_v22  ;;  %v3227_v24 = vpop.eup %3226  ;;  %v1487_v22 = vld [vmem:[#allocation9 + $0xa0] sm:$0xff] }
 0x910   :  { %3228 = vrcp.f32 %v1041_v23  ;;  %v1492_v23 = vld [vmem:[#allocation9 + $0xc8] sm:$0xff] }
 0x91a   :  { %v3229_v25 = vpop.eup %3228 }
 0x91b   :  { %v1059_v26 = vmul.f32 %v3229_v25, %v3227_v24  ;;  %v1058_v27 = vmul.f32 %v3229_v25, %v943_v58  ;;  %v1496_v24 = vld [vmem:[#allocation9 + $0xe8] sm:$0xff]  ;;  %v1462_v25 = vld [vmem:[#allocation2 + $0x6] sm:$0x3] }
 0x91d   :  { %1061 = vrot.lane.b32.xlu0 %v1059_v26, %s3520_s3  ;;  %v3011_v26 = vpack.c.bf16 %v1487_v22, %v1483_v21  ;;  %v1490_v21 = vld [vmem:[#allocation9 + $0xb8] sm:$0xff] }
 0x973   :  { %v1049_v3 = vpop.permute.xlu1 %1048 }
 0x974   :  { %v1050_v10 = vrot.slane %v1049_v3, 2  ;;  %v1495_v3 = vld [vmem:[#allocation9 + $0xe0] sm:$0xff] }
 0x976   :  { %v2828_v32 = vmul.f32 -1.442695, %v1050_v10 }
 0x98f   :  { %v1062_v29 = vpop.permute.xlu0 %1061 }
 0x990   :  { %v1064_v30 = vadd.f32 %v1062_v29, %v1058_v27  ;;  %v1460_v27 = vld [vmem:[#allocation2 + $0x2] sm:$0x3]  ;;  %v1461_v29 = vld [vmem:[#allocation2 + $0x4] sm:$0x3] }
 0x991   :  { %v1508_v10 = vcombine.low %v1461_v29, %v1462_v25  ;;  %v1489_v25 = vld [vmem:[#allocation9 + $0xb0] sm:$0xff] }
 0x992   :  { %3230 = vtanh.f32 %v1064_v30 }
 0x993   :  { %3232 = vpow2.f32 %v2828_v32  ;;  %v1459_v32 = vld [vmem:[#allocation2] sm:$0x3] }
 0x99c   :  { %v3231_v31 = vpop.eup %3230 }
 0x99d   :  { %1067 = vrot.lane.b32.xlu0 %v3231_v31, %s3520_s3  ;;  %v3233_v33 = vpop.eup %3232  ;;  %v1491_v31 = vld [vmem:[#allocation9 + $0xc0] sm:$0xff] }
 0x99e   :  { %v1055_v34 = vadd.f32 1.0, %v3233_v33  ;;  %v1507_v33 = vcombine.low %v1459_v32, %v1460_v27  ;;  %v1498_v27 = vld [vmem:[#allocation9 + $0xf8] sm:$0xff] }
 0x9a0   :  { %3234 = vrcp.f32 %v1055_v34  ;;  %v3015_v34 = vpack.c.bf16 %v1495_v3, %v1491_v31  ;;  %v1493_v31 = vld [vmem:[#allocation9 + $0xd0] sm:$0xff] }
 0x9a1   :  { %v1497_v3 = vld [vmem:[#allocation9 + $0xf0] sm:$0xff] }
 0x9aa   :  { %v3235_v35 = vpop.eup %3234 }
 0xa0f   :  { %v1068_v36 = vpop.permute.xlu0 %1067 }
 0xa10   :  { %v1070_v37 = vmul.f32 %v3235_v35, %v1068_v36  ;;  %v1522_v35 = vrot.slane %v1508_v10, %v3632_v18  ;;  %v1515_v36 = vrot.slane %v1507_v33, %v3632_v18  ;;  %v3031_v10 = vpack.c.bf16 %v1497_v3, %v1493_v31 }
 0xa12   :  { %1072 = vst.msk [vmem:[#allocation2 + $0x8] sm:$0x3] %vm587_vm1, %v1070_v37  ;;  %2829 = vmatmul.mubr.msk.f32.vlgmr.msra.gmra.mrb[8].mxu1 %vm467_vm2, %v1070_v37  ;;  %v3809_v37 = vcombine.low %v1515_v36, %v1522_v35 }
 0xa13   :  { %2988 = vmatpush1.bf16.msra.mxu1 %v3639_v38  ;;  %1382 = vmatprep.mubr.f32.mxu1 %v3518_v0 }
 0xa14   :  { %2990 = vmatprep.subr.bf16.mxu1 %v3643_v43 }
 0xa17   :  { %2992 = vmatpush1.bf16.msra.mxu1 %v3650_v50 }
 0xa18   :  { %2994 = vmatprep.subr.bf16.mxu1 %v3654_v51 }
 0xa1b   :  { %2996 = vmatpush1.bf16.msra.mxu1 %v3660_v56 }
 0xa1c   :  { %2998 = vmatprep.subr.bf16.mxu1 %v3664_v57 }
 0xa1f   :  { %3000 = vmatpush1.bf16.msra.mxu1 %v3671_v60 }
 0xae5   :  { %v1142_v39 = vpop.f32.mrb[8].mxu1 }
 0xae6   :  { %v1144_v40 = vpop.f32.mrb[9].mxu1 }
 0xae7   :  { %v1149_v41 = vcombine.low %v1142_v39, %v1144_v40 }
 0xae9   :  { %v1156_v42 = vrot.slane %v1149_v41, %v3632_v18 }
 0xaeb   :  { %v1158_v38 = vadd.f32 %v1156_v42, %v3710_v4  ;;  %v1472_v4 = vld [vmem:[#allocation9 + $0x28] sm:$0xff] }
 0xaec   :  { %v3001_v49 = vpack.c.bf16 %v1472_v4, %v1468_v48 }
 0xaed   :  { %1169 = vrot.lane.b32.xlu0 %v1158_v38, %s3520_s3  ;;  %v2830_v43 = vmul.f32 -1.442695, %v1158_v38  ;;  %v1166_v50 = vrot.slane %v1158_v38, 2 }
 0xaee   :  { %3002 = vmatprep.subr.bf16.mxu0 %v3001_v49 }
 0xaef   :  { %3236 = vpow2.f32 %v2830_v43 }
 0xaf0   :  { %3238 = vtanh.f32 %v1166_v50 }
 0xaf9   :  { %v3237_v44 = vpop.eup %3236 }
 0xafa   :  { %v1162_v51 = vadd.f32 1.0, %v3237_v44  ;;  %v3239_v56 = vpop.eup %3238 }
 0xafc   :  { %3240 = vrcp.f32 %v1162_v51 }
 0xb06   :  { %v3241_v57 = vpop.eup %3240 }
 0xb07   :  { %v1180_v45 = vmul.f32 %v3241_v57, %v3239_v56  ;;  %v1179_v60 = vmul.f32 %v3241_v57, %v1064_v30  ;;  %v3013_v30 = vpack.c.bf16 %v1496_v24, %v1492_v23  ;;  %v1485_v24 = vld [vmem:[#allocation9 + $0x90] sm:$0xff] }
 0xb08   :  { %v3027_v29 = vpack.c.bf16 %v1489_v25, %v1485_v24  ;;  %v1456_v24 = vld [vmem:[#allocation11 + $0x70] sm:$0xff] }
 0xb09   :  { %1182 = vrot.lane.b32.xlu1 %v1180_v45, %s3520_s3 }
 0xb5f   :  { %v1170_v53 = vpop.permute.xlu0 %1169 }
 0xb60   :  { %v1171_v54 = vrot.slane %v1170_v53, 2  ;;  %v1470_v53 = vld [vmem:[#allocation9 + $0x18] sm:$0xff] }
 0xb62   :  { %v2831_v28 = vmul.f32 -1.442695, %v1171_v54  ;;  %v1474_v54 = vld [vmem:[#allocation9 + $0x38] sm:$0xff] }
 0xb7b   :  { %v1183_v46 = vpop.permute.xlu1 %1182 }
 0xb7c   :  { %v3800_v47 = vadd.f32 %v1183_v46, %v1179_v60 }
 0xb7e   :  { %3242 = vtanh.f32 %v3800_v47 }
 0xb7f   :  { %3244 = vpow2.f32 %v2831_v28  ;;  %v3017_v28 = vpack.c.bf16 %v1474_v54, %v1470_v53 }
 0xb81   :  { %3018 = vmatprep.subr.bf16.mxu1 %v3017_v28  ;;  %v1443_v28 = vld [vmem:[#allocation11 + $0x8] sm:$0xff] }
 0xb88   :  { %v3243_v52 = vpop.eup %3242 }
 0xb89   :  { %1188 = vrot.lane.b32.xlu1 %v3243_v52, %s3520_s3  ;;  %v3245_v55 = vpop.eup %3244 }
 0xb8a   :  { %v1176_v58 = vadd.f32 1.0, %v3245_v55 }
 0xb8c   :  { %3246 = vrcp.f32 %v1176_v58 }
 0xb96   :  { %v3247_v2 = vpop.eup %3246 }
 0xbfb   :  { %v1189_v8 = vpop.permute.xlu1 %1188 }
 0xbfc   :  { %v1191_v12 = vmul.f32 %v3247_v2, %v1189_v8  ;;  %v1473_v2 = vld [vmem:[#allocation9 + $0x30] sm:$0xff]  ;;  %v1478_v8 = vld [vmem:[#allocation9 + $0x58] sm:$0xff] }
 0xbfe   :  { %1193 = vst.msk [vmem:[#allocation2 + $0xa] sm:$0x3] %vm587_vm1, %v1191_v12  ;;  %2832 = vmatmul.mubr.msk.f32.vlgmr.msra.gmra.mrb[10].mxu0 %vm467_vm2, %v1191_v12 }
 0xbff   :  { %3004 = vmatpush1.bf16.msra.mxu0 %v3003_v9  ;;  %1609 = vmatprep.mubr.f32.mxu0 %v3518_v0  ;;  %v1482_v9 = vld [vmem:[#allocation9 + $0x78] sm:$0xff] }
 0xc00   :  { %3006 = vmatprep.subr.bf16.mxu0 %v3005_v13  ;;  %v3021_v16 = vpack.c.bf16 %v1482_v9, %v1478_v8  ;;  %v1446_v8 = vld [vmem:[#allocation11 + $0x20] sm:$0xff]  ;;  %v1448_v9 = vld [vmem:[#allocation11 + $0x30] sm:$0xff] }
 0xc03   :  { %3008 = vmatpush1.bf16.msra.mxu0 %v3007_v19  ;;  %v1481_v19 = vld [vmem:[#allocation9 + $0x70] sm:$0xff] }
 0xc04   :  { %3010 = vmatprep.subr.bf16.mxu0 %v3009_v20  ;;  %v1486_v20 = vld [vmem:[#allocation9 + $0x98] sm:$0xff]  ;;  %v3023_v22 = vpack.c.bf16 %v1481_v19, %v1477_v17  ;;  %v1452_v17 = vld [vmem:[#allocation11 + $0x50] sm:$0xff] }
 0xc05   :  { %v3025_v23 = vpack.c.bf16 %v1490_v21, %v1486_v20  ;;  %v1455_v20 = vld [vmem:[#allocation11 + $0x68] sm:$0xff]  ;;  %v1457_v21 = vld [vmem:[#allocation11 + $0x78] sm:$0xff] }
 0xc07   :  { %3012 = vmatpush1.bf16.msra.mxu0 %v3011_v26  ;;  %v1494_v26 = vld [vmem:[#allocation9 + $0xd8] sm:$0xff] }
 0xc08   :  { %3014 = vmatprep.subr.bf16.mxu0 %v3013_v30  ;;  %v3029_v30 = vpack.c.bf16 %v1498_v27, %v1494_v26 }
 0xc0b   :  { %3016 = vmatpush1.bf16.msra.mxu0 %v3015_v34 }
 0xc0e   :  { %2838 = vmatmul.mubr.msk.f32.vlgmr.msra.gmra.mrb[12].mxu0 %vm467_vm2, %v3809_v37 }
 0xc0f   :  { %1615 = vmatprep.mubr.f32.mxu0 %v3518_v0 }
 0xcd1   :  { %v1263_v39 = vpop.f32.mrb[10].mxu0 }
 0xcd2   :  { %v1265_v40 = vpop.f32.mrb[11].mxu0 }
 0xcd3   :  { %v1270_v41 = vcombine.low %v1263_v39, %v1265_v40 }
 0xcd5   :  { %v1277_v42 = vrot.slane %v1270_v41, %v3632_v18 }
 0xcd7   :  { %v1279_v38 = vadd.f32 %v1277_v42, %v3712_v6 }
 0xcd9   :  { %1290 = vrot.lane.b32.xlu1 %v1279_v38, %s3520_s3  ;;  %v2833_v43 = vmul.f32 -1.442695, %v1279_v38  ;;  %v1287_v51 = vrot.slane %v1279_v38, 2 }
 0xcdb   :  { %3248 = vpow2.f32 %v2833_v43 }
 0xcdc   :  { %3250 = vtanh.f32 %v1287_v51 }
 0xce1   :  { %v3817_v50 = vpop.f32.mrb[12].mxu0 }
 0xce2   :  { %v3819_v44 = vpop.f32.mrb[13].mxu0 }
 0xce3   :  { %v1707_v56 = vcombine.low %v3817_v50, %v3819_v44  ;;  %v1708_v57 = vcombine.high %v3817_v50, %v3819_v44 }
 0xce5   :  { %v3249_v45 = vpop.eup %3248 }
 0xce6   :  { %v1283_v60 = vadd.f32 1.0, %v3249_v45  ;;  %v3251_v6 = vpop.eup %3250 }
 0xce8   :  { %3252 = vrcp.f32 %v1283_v60 }
 0xcf2   :  { %v3253_v46 = vpop.eup %3252 }
 0xcf3   :  { %v1301_v48 = vmul.f32 %v3253_v46, %v3251_v6  ;;  %v1300_v4 = vmul.f32 %v3253_v46, %v3800_v47  ;;  %v1469_v47 = vld [vmem:[#allocation9 + $0x10] sm:$0xff] }
 0xcf4   :  { %v3019_v14 = vpack.c.bf16 %v1473_v2, %v1469_v47 }
 0xcf5   :  { %1303 = vrot.lane.b32.xlu0 %v1301_v48, %s3520_s3 }
 0xd4b   :  { %v1291_v58 = vpop.permute.xlu1 %1290 }
 0xd4c   :  { %v1292_v59 = vrot.slane %v1291_v58, 2  ;;  %v1442_v58 = vld [vmem:[#allocation11] sm:$0xff] }
 0xd4e   :  { %v2834_v11 = vmul.f32 -1.442695, %v1292_v59 }
 0xd67   :  { %v1304_v49 = vpop.permute.xlu0 %1303 }
 0xd68   :  { %v3827_v52 = vadd.f32 %v1304_v49, %v1300_v4 }
 0xd6a   :  { %3254 = vtanh.f32 %v3827_v52 }
 0xd6b   :  { %3256 = vpow2.f32 %v2834_v11  ;;  %v1444_v11 = vld [vmem:[#allocation11 + $0x10] sm:$0xff] }
 0xd6c   :  { %v3862_v47 = vpack.c.bf16 %v1444_v11, %v1442_v58 }
 0xd74   :  { %v3255_v55 = vpop.eup %3254 }
 0xd75   :  { %1309 = vrot.lane.b32.xlu0 %v3255_v55, %s3520_s3  ;;  %v3257_v63 = vpop.eup %3256  ;;  %v1445_v55 = vld [vmem:[#allocation11 + $0x18] sm:$0xff] }
 0xd76   :  { %v1297_v1 = vadd.f32 1.0, %v3257_v63  ;;  %v3860_v59 = vpack.c.bf16 %v1445_v55, %v1443_v28  ;;  %v1447_v63 = vld [vmem:[#allocation11 + $0x28] sm:$0xff] }
 0xd78   :  { %3258 = vrcp.f32 %v1297_v1  ;;  %v1449_v1 = vld [vmem:[#allocation11 + $0x38] sm:$0xff]  ;;  %3034 = vmatprep.subr.bf16.mxu0 %v3860_v59 }
 0xd79   :  { %v3864_v2 = vpack.c.bf16 %v1449_v1, %v1447_v63  ;;  %3036 = vmatpush1.bf16.msra.mxu0 %v3862_v47 }
 0xd7b   :  { %3038 = vmatprep.subr.bf16.mxu0 %v3864_v2 }
 0xd82   :  { %v3259_v12 = vpop.eup %3258 }
 0xde7   :  { %v1310_v13 = vpop.permute.xlu0 %1309 }
 0xde8   :  { %v1312_v15 = vmul.f32 %v3259_v12, %v1310_v13  ;;  %v1451_v12 = vld [vmem:[#allocation11 + $0x48] sm:$0xff]  ;;  %v3869_v13 = vpack.c.bf16 %v1448_v9, %v1446_v8 }
 0xdea   :  { %1314 = vst.msk [vmem:[#allocation2 + $0xc] sm:$0x3] %vm587_vm1, %v1312_v15  ;;  %2835 = vmatmul.mubr.msk.f32.vlgmr.msra.gmra.mrb[10].mxu1 %vm467_vm2, %v1312_v15  ;;  %3040 = vmatpush1.bf16.msra.mxu0 %v3869_v13 }
 0xdeb   :  { %3020 = vmatpush1.bf16.msra.mxu1 %v3019_v14  ;;  %1686 = vmatprep.mubr.f32.mxu1 %v3518_v0 }
 0xdec   :  { %3022 = vmatprep.subr.bf16.mxu1 %v3021_v16  ;;  %v1450_v16 = vld [vmem:[#allocation11 + $0x40] sm:$0xff] }
 0xded   :  { %v3881_v19 = vpack.c.bf16 %v1452_v17, %v1450_v16 }
 0xdef   :  { %3024 = vmatpush1.bf16.msra.mxu1 %v3023_v22  ;;  %v1454_v22 = vld [vmem:[#allocation11 + $0x60] sm:$0xff] }
 0xdf0   :  { %3026 = vmatprep.subr.bf16.mxu1 %v3025_v23  ;;  %v3883_v23 = vpack.c.bf16 %v1457_v21, %v1455_v20  ;;  %v3886_v25 = vpack.c.bf16 %v1456_v24, %v1454_v22 }
 0xdf3   :  { %3028 = vmatpush1.bf16.msra.mxu1 %v3027_v29 }
 0xdf4   :  { %3030 = vmatprep.subr.bf16.mxu1 %v3029_v30 }
 0xdf7   :  { %3032 = vmatpush1.bf16.msra.mxu1 %v3031_v10 }
 0xdf8   :  { %3050 = vmatprep.subr.bf16.mxu1 %v3860_v59 }
 0xdfa   :  { %2840 = vmatmul.mubr.msk.f32.vlgmr.msra.gmra.mrb[12].mxu1 %vm467_vm2, %v3809_v37  ;;  %v1717_v37 = vrot.slane %v1707_v56, %v3632_v18 }
 0xdfb   :  { %1692 = vmatprep.mubr.f32.mxu1 %v3518_v0  ;;  %3052 = vmatpush1.bf16.msra.mxu1 %v3862_v47 }
 0xdfc   :  { %3054 = vmatprep.subr.bf16.mxu1 %v3864_v2 }
 0xdff   :  { %3056 = vmatpush1.bf16.msra.mxu1 %v3869_v13 }
 0xebd   :  { %v1384_v32 = vpop.f32.mrb[10].mxu1 }
 0xebe   :  { %v1386_v33 = vpop.f32.mrb[11].mxu1 }
 0xebf   :  { %v1391_v34 = vcombine.low %v1384_v32, %v1386_v33  ;;  %v1464_v33 = vld [vmem:[#allocation2 + $0xa] sm:$0x3] }
 0xec1   :  { %v1398_v35 = vrot.slane %v1391_v34, %v3632_v18  ;;  %v1463_v34 = vld [vmem:[#allocation2 + $0x8] sm:$0x3] }
 0xec3   :  { %v1400_v36 = vadd.f32 %v1398_v35, %v3714_v7  ;;  %v1724_v7 = vrot.slane %v1708_v57, %v3632_v18  ;;  %v1524_v35 = vcombine.low %v1463_v34, %v1464_v33 }
 0xec5   :  { %1411 = vrot.lane.b32.xlu0 %v1400_v36, %s3520_s3  ;;  %v2836_v39 = vmul.f32 -1.442695, %v1400_v36  ;;  %v1408_v41 = vrot.slane %v1400_v36, 2  ;;  %v1465_v36 = vld [vmem:[#allocation2 + $0xc] sm:$0x3] }
 0xec7   :  { %3260 = vpow2.f32 %v2836_v39 }
 0xec8   :  { %3262 = vtanh.f32 %v1408_v41  ;;  %v1532_v41 = vrot.slane %v1524_v35, %v3632_v18 }
 0xecd   :  { %v1688_v40 = vpop.f32.mrb[12].mxu1 }
 0xece   :  { %v1690_v42 = vpop.f32.mrb[13].mxu1 }
 0xecf   :  { %v1709_v38 = vcombine.low %v1688_v40, %v1690_v42  ;;  %v1710_v43 = vcombine.high %v1688_v40, %v1690_v42 }
 0xed1   :  { %v3261_v51 = vpop.eup %3260  ;;  %v1731_v45 = vrot.slane %v1709_v38, %v3632_v18  ;;  %v1738_v60 = vrot.slane %v1710_v43, %v3632_v18  ;;  %v1458_v43 = vld [vmem:[%s4055_s6] sm:$0x3]  ;;  %s3521_s6 = smov 96  }
 0xed2   :  { %v1404_v6 = vadd.f32 1.0, %v3261_v51  ;;  %v3263_v56 = vpop.eup %3262  ;;  %v1794_v51 = vrot.slane %v1458_v43, %v423_v61 }
 0xed3   :  { %v3850_v46 = vcombine.low %v1717_v37, %v1731_v45  ;;  %v3852_v48 = vcombine.high %v1717_v37, %v1731_v45  ;;  %v3854_v4 = vcombine.low %v1724_v7, %v1738_v60  ;;  %v3856_v49 = vcombine.high %v1724_v7, %v1738_v60 }
 0xed4   :  { %3264 = vrcp.f32 %v1404_v6  ;;  %v1798_v37 = vrot.slane %v1458_v43, %v427_v62 }
 0xed5   :  { %v1821_v5 = vrot.slane %v3856_v49, 4  ;;  %v1825_v62 = vrot.slane %v3854_v4, 4 }
 0xede   :  { %v3265_v53 = vpop.eup %3264 }
 0xedf   :  { %v1422_v54 = vmul.f32 %v3265_v53, %v3263_v56  ;;  %v1421_v50 = vmul.f32 %v3265_v53, %v3827_v52  ;;  %v1453_v52 = vld [vmem:[#allocation11 + $0x58] sm:$0xff] }
 0xee0   :  { %v3873_v14 = vpack.c.bf16 %v1453_v52, %v1451_v12  ;;  %v1829_v12 = vrot.slane %v3852_v48, 4  ;;  %v1833_v52 = vrot.slane %v3850_v46, 4 }
 0xee1   :  { %1424 = vrot.lane.b32.xlu1 %v1422_v54, %s3520_s3 }
 0xee2   :  { %3042 = vmatprep.subr.bf16.mxu0 %v3873_v14  ;;  %3058 = vmatprep.subr.bf16.mxu1 %v3873_v14 }
 0xee3   :  { %3044 = vmatpush1.bf16.msra.mxu0 %v3881_v19  ;;  %3060 = vmatpush1.bf16.msra.mxu1 %v3881_v19 }
 0xee4   :  { %3046 = vmatprep.subr.bf16.mxu0 %v3883_v23  ;;  %3062 = vmatprep.subr.bf16.mxu1 %v3883_v23 }
 0xee7   :  { %3048 = vmatpush1.bf16.msra.mxu0 %v3886_v25  ;;  %3064 = vmatpush1.bf16.msra.mxu1 %v3886_v25 }
 0xee8   :  { %3066 = vmatprep.subr.bf16.mxu0 %v3860_v59  ;;  %3082 = vmatprep.subr.bf16.mxu1 %v3860_v59 }
 0xf37   :  { %v1412_v26 = vpop.permute.xlu0 %1411 }
 0xf38   :  { %v1413_v27 = vrot.slane %v1412_v26, 2 }
 0xf3a   :  { %v2837_v29 = vmul.f32 -1.442695, %v1413_v27 }
 0xf53   :  { %v1425_v44 = vpop.permute.xlu1 %1424 }
 0xf54   :  { %v1427_v57 = vadd.f32 %v1425_v44, %v1421_v50  ;;  %v1799_v44 = vcombine.low %v1794_v51, %v1798_v37 }
 0xf56   :  { %3266 = vtanh.f32 %v1427_v57  ;;  %v1806_v16 = vrot.slane %v1799_v44, %v3632_v18 }
 0xf57   :  { %3268 = vpow2.f32 %v2837_v29 }
 0xf60   :  { %v3267_v15 = vpop.eup %3266 }
 0xf61   :  { %1430 = vrot.lane.b32.xlu1 %v3267_v15, %s3520_s3  ;;  %v3269_v30 = vpop.eup %3268 }
 0xf62   :  { %v1418_v31 = vadd.f32 1.0, %v3269_v30 }
 0xf64   :  { %3270 = vrcp.f32 %v1418_v31 }
 0xf6e   :  { %v3271_v3 = vpop.eup %3270 }
 0xfd3   :  { %v1431_v10 = vpop.permute.xlu1 %1430 }
 0xfd4   :  { %v3895_v32 = vmul.f32 %v3271_v3, %v1431_v10 }
 0xfd6   :  { %1435 = vst.msk [vmem:[#allocation2 + $0xe] sm:$0x3] %vm587_vm1, %v3895_v32 }
 0xfdd   :  { %v1466_v39 = vld [vmem:[#allocation2 + $0xe] sm:$0x3] }
 0xfde   :  { %v1525_v40 = vcombine.low %v1465_v36, %v1466_v39 }
 0xfe0   :  { %v1539_v42 = vrot.slane %v1525_v40, %v3632_v18 }
 0xfe2   :  { %v1540_v38 = vcombine.low %v1532_v41, %v1539_v42 }
 0xfe4   :  { %2839 = vmatmul.mubr.msk.f32.gmra.mrb[14].mxu0 %vm467_vm2, %v1540_v38  ;;  %2841 = vmatmul.mubr.msk.f32.gmra.mrb[14].mxu1 %vm467_vm2, %v1540_v38 }
 0xfe5   :  { %1901 = vmatprep.mubr.f32.mxu0 %v3518_v0  ;;  %2020 = vmatprep.mubr.f32.mxu1 %v3518_v0 }
 0xfe8   :  { %1902 = vmatmul.mubr.f32.vlgmr.msra.gmra.mrb[16].mxu0 %v3518_v0 }
 0xfe9   :  { %3068 = vmatpush1.bf16.msra.mxu0 %v3862_v47  ;;  %2139 = vmatprep.mubr.f32.mxu0 %v3518_v0 }
 0xfea   :  { %3070 = vmatprep.subr.bf16.mxu0 %v3864_v2 }
 0xfed   :  { %3072 = vmatpush1.bf16.msra.mxu0 %v3869_v13 }
 0xfee   :  { %3074 = vmatprep.subr.bf16.mxu0 %v3873_v14 }
 0xff1   :  { %3076 = vmatpush1.bf16.msra.mxu0 %v3881_v19 }
 0xff2   :  { %3078 = vmatprep.subr.bf16.mxu0 %v3883_v23 }
 0xff5   :  { %3080 = vmatpush1.bf16.msra.mxu0 %v3886_v25 }
 0xff6   :  { %3098 = vmatprep.subr.bf16.mxu0 %v3860_v59 }
0x10b7   :  { %v1617_v7 = vpop.f32.mrb[14].mxu0  ;;  %v1694_v45 = vpop.f32.mrb[14].mxu1 }
0x10b8   :  { %v1619_v60 = vpop.f32.mrb[15].mxu0  ;;  %v1696_v6 = vpop.f32.mrb[15].mxu1 }
0x10b9   :  { %v1743_v56 = vcombine.low %v1617_v7, %v1619_v60  ;;  %v1744_v53 = vcombine.high %v1617_v7, %v1619_v60  ;;  %v1745_v54 = vcombine.low %v1694_v45, %v1696_v6  ;;  %v1746_v50 = vcombine.high %v1694_v45, %v1696_v6 }
0x10bb   :  { %v1753_v57 = vrot.slane %v1743_v56, %v3632_v18  ;;  %v1760_v28 = vrot.slane %v1744_v53, %v3632_v18  ;;  %v1767_v55 = vrot.slane %v1745_v54, %v3632_v18  ;;  %v1774_v61 = vrot.slane %v1746_v50, %v3632_v18  ;;  %v1903_v58 = vpop.f32.mrb[16].mxu0 }
0x10bc   :  { %v1905_v11 = vpop.f32.mrb[17].mxu0 }
0x10bd   :  { %v1775_v63 = vcombine.low %v1753_v57, %v1767_v55  ;;  %v1776_v1 = vcombine.high %v1753_v57, %v1767_v55  ;;  %v1777_v8 = vcombine.low %v1760_v28, %v1774_v61  ;;  %v1778_v9 = vcombine.high %v1760_v28, %v1774_v61 }
0x10be   :  { %v1910_v15 = vcombine.low %v1903_v58, %v1905_v11 }
0x10bf   :  { %v1787_v17 = vrot.slane %v1778_v9, 4  ;;  %v1809_v20 = vrot.slane %v1777_v8, 4  ;;  %v1813_v21 = vrot.slane %v1776_v1, 4  ;;  %v1817_v22 = vrot.slane %v1775_v63, 4 }
0x10c0   :  { %v1823_v24 = vadd.f32 %v1821_v5, %v1775_v63  ;;  %v1827_v26 = vadd.f32 %v1825_v62, %v1776_v1  ;;  %v1831_v27 = vadd.f32 %v1829_v12, %v1777_v8  ;;  %v1835_v29 = vadd.f32 %v1833_v52, %v1778_v9 }
0x10c1   :  { %v1917_v30 = vrot.slane %v1910_v15, %v3632_v18  ;;  %v1789_v31 = vadd.f32 %v1787_v17, %v3850_v46  ;;  %v1811_v3 = vadd.f32 %v1809_v20, %v3852_v48  ;;  %v1815_v10 = vadd.f32 %v1813_v21, %v3854_v4 }
0x10c2   :  { %v1819_v33 = vadd.f32 %v1817_v22, %v3856_v49  ;;  %v3936_v34 = vadd.f32 %v1823_v24, %v1806_v16  ;;  %v3938_v35 = vadd.f32 %v1827_v26, %v1806_v16  ;;  %v3940_v36 = vadd.f32 %v1831_v27, %v1806_v16 }
0x10c3   :  { %v1808_v39 = vadd.f32 %v1806_v16, %v1789_v31  ;;  %v1812_v40 = vadd.f32 %v1811_v3, %v1806_v16  ;;  %v3942_v41 = vadd.f32 %v1815_v10, %v1806_v16  ;;  %v3944_v42 = vadd.f32 %v1835_v29, %v1806_v16 }
0x10c4   :  { %v3946_v38 = vadd.f32 %v1819_v33, %v1806_v16 }
0x10c5   :  { %v1919_v46 = vadd.f32 %v1917_v30, %v1808_v39 }
0x10c7   :  { %1930 = vrot.lane.b32.xlu1 %v1919_v46, %s3520_s3  ;;  %v2842_v48 = vmul.f32 -1.442695, %v1919_v46  ;;  %v1927_v4 = vrot.slane %v1919_v46, 2 }
0x10c9   :  { %3272 = vpow2.f32 %v2842_v48 }
0x10ca   :  { %3274 = vtanh.f32 %v1927_v4 }
0x10d3   :  { %v3273_v49 = vpop.eup %3272 }
0x10d4   :  { %v1923_v43 = vadd.f32 1.0, %v3273_v49  ;;  %v3275_v51 = vpop.eup %3274 }
0x10d6   :  { %3276 = vrcp.f32 %v1923_v43 }
0x10e0   :  { %v3277_v37 = vpop.eup %3276 }
0x10e1   :  { %v1941_v7 = vmul.f32 %v3277_v37, %v3275_v51  ;;  %v1940_v45 = vmul.f32 0.0, %v3277_v37 }
0x10e3   :  { %1943 = vrot.lane.b32.xlu0 %v1941_v7, %s3520_s3 }
0x1139   :  { %v1931_v53 = vpop.permute.xlu1 %1930 }
0x113a   :  { %v1932_v54 = vrot.slane %v1931_v53, 2 }
0x113c   :  { %v2843_v50 = vmul.f32 -1.442695, %v1932_v54 }
0x1155   :  { %v1944_v60 = vpop.permute.xlu0 %1943 }
0x1156   :  { %v1946_v6 = vadd.f32 %v1944_v60, %v1940_v45 }
0x1158   :  { %3278 = vtanh.f32 %v1946_v6 }
0x1159   :  { %3280 = vpow2.f32 %v2843_v50 }
0x1162   :  { %v3279_v56 = vpop.eup %3278 }
0x1163   :  { %1949 = vrot.lane.b32.xlu0 %v3279_v56, %s3520_s3  ;;  %v3281_v44 = vpop.eup %3280 }
0x1164   :  { %v1937_v57 = vadd.f32 1.0, %v3281_v44 }
0x1166   :  { %3282 = vrcp.f32 %v1937_v57 }
0x1170   :  { %v3283_v28 = vpop.eup %3282 }
0x11d5   :  { %v1950_v55 = vpop.permute.xlu0 %1949 }
0x11d6   :  { %v1952_v61 = vmul.f32 %v3283_v28, %v1950_v55 }
0x11d8   :  { %2844 = vmatmul.mubr.msk.f32.vlgmr.msra.gmra.mrb[16].mxu1 %vm467_vm2, %v1952_v61 }
0x11d9   :  { %3084 = vmatpush1.bf16.msra.mxu1 %v3862_v47  ;;  %2258 = vmatprep.mubr.f32.mxu1 %v3518_v0 }
0x11da   :  { %3086 = vmatprep.subr.bf16.mxu1 %v3864_v2 }
0x11dd   :  { %3088 = vmatpush1.bf16.msra.mxu1 %v3869_v13 }
0x11de   :  { %3090 = vmatprep.subr.bf16.mxu1 %v3873_v14 }
0x11e1   :  { %3092 = vmatpush1.bf16.msra.mxu1 %v3881_v19 }
0x11e2   :  { %3094 = vmatprep.subr.bf16.mxu1 %v3883_v23 }
0x11e5   :  { %3096 = vmatpush1.bf16.msra.mxu1 %v3886_v25 }
0x11e6   :  { %3114 = vmatprep.subr.bf16.mxu1 %v3860_v59 }
0x12ab   :  { %v2022_v58 = vpop.f32.mrb[16].mxu1 }
0x12ac   :  { %v2024_v5 = vpop.f32.mrb[17].mxu1 }
0x12ad   :  { %v2029_v62 = vcombine.low %v2022_v58, %v2024_v5 }
0x12af   :  { %v2036_v11 = vrot.slane %v2029_v62, %v3632_v18 }
0x12b1   :  { %v2038_v63 = vadd.f32 %v2036_v11, %v1812_v40 }
0x12b3   :  { %2049 = vrot.lane.b32.xlu0 %v2038_v63, %s3520_s3  ;;  %v2845_v1 = vmul.f32 -1.442695, %v2038_v63  ;;  %v2046_v8 = vrot.slane %v2038_v63, 2 }
0x12b5   :  { %3284 = vpow2.f32 %v2845_v1 }
0x12b6   :  { %3286 = vtanh.f32 %v2046_v8 }
0x12bf   :  { %v3285_v9 = vpop.eup %3284 }
0x12c0   :  { %v2042_v12 = vadd.f32 1.0, %v3285_v9  ;;  %v3287_v52 = vpop.eup %3286 }
0x12c2   :  { %3288 = vrcp.f32 %v2042_v12 }
0x12cc   :  { %v3289_v15 = vpop.eup %3288 }
0x12cd   :  { %v2060_v16 = vmul.f32 %v3289_v15, %v3287_v52  ;;  %v2059_v17 = vmul.f32 %v3289_v15, %v1946_v6 }
0x12cf   :  { %2062 = vrot.lane.b32.xlu1 %v2060_v16, %s3520_s3 }
0x1325   :  { %v2050_v24 = vpop.permute.xlu0 %2049 }
0x1326   :  { %v2051_v26 = vrot.slane %v2050_v24, 2 }
0x1328   :  { %v2846_v27 = vmul.f32 -1.442695, %v2051_v26 }
0x1341   :  { %v2063_v20 = vpop.permute.xlu1 %2062 }
0x1342   :  { %v2065_v21 = vadd.f32 %v2063_v20, %v2059_v17 }
0x1344   :  { %3290 = vtanh.f32 %v2065_v21 }
0x1345   :  { %3292 = vpow2.f32 %v2846_v27 }
0x134e   :  { %v3291_v22 = vpop.eup %3290 }
0x134f   :  { %2068 = vrot.lane.b32.xlu1 %v3291_v22, %s3520_s3  ;;  %v3293_v29 = vpop.eup %3292 }
0x1350   :  { %v2056_v30 = vadd.f32 1.0, %v3293_v29 }
0x1352   :  { %3294 = vrcp.f32 %v2056_v30 }
0x135c   :  { %v3295_v31 = vpop.eup %3294 }
0x13c1   :  { %v2069_v3 = vpop.permute.xlu1 %2068 }
0x13c2   :  { %v2071_v10 = vmul.f32 %v3295_v31, %v2069_v3 }
0x13c4   :  { %2847 = vmatmul.mubr.msk.f32.vlgmr.msra.gmra.mrb[18].mxu0 %vm467_vm2, %v2071_v10 }
0x13c5   :  { %3100 = vmatpush1.bf16.msra.mxu0 %v3862_v47  ;;  %2377 = vmatprep.mubr.f32.mxu0 %v3518_v0 }
0x13c6   :  { %3102 = vmatprep.subr.bf16.mxu0 %v3864_v2 }
0x13c9   :  { %3104 = vmatpush1.bf16.msra.mxu0 %v3869_v13 }
0x13ca   :  { %3106 = vmatprep.subr.bf16.mxu0 %v3873_v14 }
0x13cd   :  { %3108 = vmatpush1.bf16.msra.mxu0 %v3881_v19 }
0x13ce   :  { %3110 = vmatprep.subr.bf16.mxu0 %v3883_v23 }
0x13d1   :  { %3112 = vmatpush1.bf16.msra.mxu0 %v3886_v25 }
0x13d2   :  { %3130 = vmatprep.subr.bf16.mxu0 %v3860_v59 }
0x1497   :  { %v2141_v33 = vpop.f32.mrb[18].mxu0 }
0x1498   :  { %v2143_v39 = vpop.f32.mrb[19].mxu0 }
0x1499   :  { %v2148_v40 = vcombine.low %v2141_v33, %v2143_v39 }
0x149b   :  { %v2155_v46 = vrot.slane %v2148_v40, %v3632_v18 }
0x149d   :  { %v2157_v48 = vadd.f32 %v2155_v46, %v3942_v41 }
0x149f   :  { %2168 = vrot.lane.b32.xlu1 %v2157_v48, %s3520_s3  ;;  %v2848_v4 = vmul.f32 -1.442695, %v2157_v48  ;;  %v2165_v49 = vrot.slane %v2157_v48, 2 }
0x14a1   :  { %3296 = vpow2.f32 %v2848_v4 }
0x14a2   :  { %3298 = vtanh.f32 %v2165_v49 }
0x14ab   :  { %v3297_v43 = vpop.eup %3296 }
0x14ac   :  { %v2161_v51 = vadd.f32 1.0, %v3297_v43  ;;  %v3299_v37 = vpop.eup %3298 }
0x14ae   :  { %3300 = vrcp.f32 %v2161_v51 }
0x14b8   :  { %v3301_v7 = vpop.eup %3300 }
0x14b9   :  { %v2179_v45 = vmul.f32 %v3301_v7, %v3299_v37  ;;  %v2178_v60 = vmul.f32 %v3301_v7, %v2065_v21 }
0x14bb   :  { %2181 = vrot.lane.b32.xlu0 %v2179_v45, %s3520_s3 }
0x1511   :  { %v2169_v41 = vpop.permute.xlu1 %2168 }
0x1512   :  { %v2170_v54 = vrot.slane %v2169_v41, 2 }
0x1514   :  { %v2849_v50 = vmul.f32 -1.442695, %v2170_v54 }
0x152d   :  { %v2182_v6 = vpop.permute.xlu0 %2181 }
0x152e   :  { %v2184_v56 = vadd.f32 %v2182_v6, %v2178_v60 }
0x1530   :  { %3302 = vtanh.f32 %v2184_v56 }
0x1531   :  { %3304 = vpow2.f32 %v2849_v50 }
0x153a   :  { %v3303_v53 = vpop.eup %3302 }
0x153b   :  { %2187 = vrot.lane.b32.xlu0 %v3303_v53, %s3520_s3  ;;  %v3305_v44 = vpop.eup %3304 }
0x153c   :  { %v2175_v57 = vadd.f32 1.0, %v3305_v44 }
0x153e   :  { %3306 = vrcp.f32 %v2175_v57 }
0x1548   :  { %v3307_v28 = vpop.eup %3306 }
0x15ad   :  { %v2188_v55 = vpop.permute.xlu0 %2187 }
0x15ae   :  { %v2190_v61 = vmul.f32 %v3307_v28, %v2188_v55 }
0x15b0   :  { %2850 = vmatmul.mubr.msk.f32.vlgmr.msra.gmra.mrb[18].mxu1 %vm467_vm2, %v2190_v61 }
0x15b1   :  { %3116 = vmatpush1.bf16.msra.mxu1 %v3862_v47  ;;  %2496 = vmatprep.mubr.f32.mxu1 %v3518_v0 }
0x15b2   :  { %3118 = vmatprep.subr.bf16.mxu1 %v3864_v2 }
0x15b5   :  { %3120 = vmatpush1.bf16.msra.mxu1 %v3869_v13 }
0x15b6   :  { %3122 = vmatprep.subr.bf16.mxu1 %v3873_v14 }
0x15b9   :  { %3124 = vmatpush1.bf16.msra.mxu1 %v3881_v19 }
0x15ba   :  { %3126 = vmatprep.subr.bf16.mxu1 %v3883_v23 }
0x15bd   :  { %3128 = vmatpush1.bf16.msra.mxu1 %v3886_v25 }
0x15be   :  { %3146 = vmatprep.subr.bf16.mxu1 %v3860_v59 }
0x1683   :  { %v2260_v58 = vpop.f32.mrb[18].mxu1 }
0x1684   :  { %v2262_v5 = vpop.f32.mrb[19].mxu1 }
0x1685   :  { %v2267_v62 = vcombine.low %v2260_v58, %v2262_v5 }
0x1687   :  { %v2274_v11 = vrot.slane %v2267_v62, %v3632_v18 }
0x1689   :  { %v2276_v63 = vadd.f32 %v2274_v11, %v3946_v38 }
0x168b   :  { %2287 = vrot.lane.b32.xlu0 %v2276_v63, %s3520_s3  ;;  %v2851_v1 = vmul.f32 -1.442695, %v2276_v63  ;;  %v2284_v8 = vrot.slane %v2276_v63, 2 }
0x168d   :  { %3308 = vpow2.f32 %v2851_v1 }
0x168e   :  { %3310 = vtanh.f32 %v2284_v8 }
0x1697   :  { %v3309_v9 = vpop.eup %3308 }
0x1698   :  { %v2280_v12 = vadd.f32 1.0, %v3309_v9  ;;  %v3311_v52 = vpop.eup %3310 }
0x169a   :  { %3312 = vrcp.f32 %v2280_v12 }
0x16a4   :  { %v3313_v15 = vpop.eup %3312 }
0x16a5   :  { %v2298_v16 = vmul.f32 %v3313_v15, %v3311_v52  ;;  %v2297_v59 = vmul.f32 %v3313_v15, %v2184_v56 }
0x16a7   :  { %2300 = vrot.lane.b32.xlu1 %v2298_v16, %s3520_s3 }
0x16fd   :  { %v2288_v38 = vpop.permute.xlu0 %2287 }
0x16fe   :  { %v2289_v22 = vrot.slane %v2288_v38, 2 }
0x1700   :  { %v2852_v24 = vmul.f32 -1.442695, %v2289_v22 }
0x1719   :  { %v2301_v17 = vpop.permute.xlu1 %2300 }
0x171a   :  { %v2303_v20 = vadd.f32 %v2301_v17, %v2297_v59 }
0x171c   :  { %3314 = vtanh.f32 %v2303_v20 }
0x171d   :  { %3316 = vpow2.f32 %v2852_v24 }
0x1726   :  { %v3315_v21 = vpop.eup %3314 }
0x1727   :  { %2306 = vrot.lane.b32.xlu1 %v3315_v21, %s3520_s3  ;;  %v3317_v26 = vpop.eup %3316 }
0x1728   :  { %v2294_v27 = vadd.f32 1.0, %v3317_v26 }
0x172a   :  { %3318 = vrcp.f32 %v2294_v27 }
0x1734   :  { %v3319_v29 = vpop.eup %3318 }
0x1799   :  { %v2307_v30 = vpop.permute.xlu1 %2306 }
0x179a   :  { %v2309_v31 = vmul.f32 %v3319_v29, %v2307_v30 }
0x179c   :  { %2853 = vmatmul.mubr.msk.f32.vlgmr.msra.gmra.mrb[20].mxu0 %vm467_vm2, %v2309_v31 }
0x179d   :  { %3132 = vmatpush1.bf16.msra.mxu0 %v3862_v47  ;;  %2615 = vmatprep.mubr.f32.mxu0 %v3518_v0 }
0x179e   :  { %3134 = vmatprep.subr.bf16.mxu0 %v3864_v2 }
0x17a1   :  { %3136 = vmatpush1.bf16.msra.mxu0 %v3869_v13 }
0x17a2   :  { %3138 = vmatprep.subr.bf16.mxu0 %v3873_v14 }
0x17a5   :  { %3140 = vmatpush1.bf16.msra.mxu0 %v3881_v19 }
0x17a6   :  { %3142 = vmatprep.subr.bf16.mxu0 %v3883_v23 }
0x17a9   :  { %3144 = vmatpush1.bf16.msra.mxu0 %v3886_v25 }
0x186f   :  { %v2379_v3 = vpop.f32.mrb[20].mxu0 }
0x1870   :  { %v2381_v10 = vpop.f32.mrb[21].mxu0 }
0x1871   :  { %v2386_v33 = vcombine.low %v2379_v3, %v2381_v10 }
0x1873   :  { %v2393_v39 = vrot.slane %v2386_v33, %v3632_v18 }
0x1875   :  { %v2395_v40 = vadd.f32 %v2393_v39, %v3936_v34 }
0x1877   :  { %2406 = vrot.lane.b32.xlu1 %v2395_v40, %s3520_s3  ;;  %v2854_v46 = vmul.f32 -1.442695, %v2395_v40  ;;  %v2403_v48 = vrot.slane %v2395_v40, 2 }
0x1879   :  { %3320 = vpow2.f32 %v2854_v46 }
0x187a   :  { %3322 = vtanh.f32 %v2403_v48 }
0x1883   :  { %v3321_v4 = vpop.eup %3320 }
0x1884   :  { %v2399_v49 = vadd.f32 1.0, %v3321_v4  ;;  %v3323_v43 = vpop.eup %3322 }
0x1886   :  { %3324 = vrcp.f32 %v2399_v49 }
0x1890   :  { %v3325_v51 = vpop.eup %3324 }
0x1891   :  { %v2417_v37 = vmul.f32 %v3325_v51, %v3323_v43  ;;  %v2416_v7 = vmul.f32 %v3325_v51, %v2303_v20 }
0x1893   :  { %2419 = vrot.lane.b32.xlu0 %v2417_v37, %s3520_s3 }
0x18e9   :  { %v2407_v34 = vpop.permute.xlu1 %2406 }
0x18ea   :  { %v2408_v56 = vrot.slane %v2407_v34, 2 }
0x18ec   :  { %v2855_v53 = vmul.f32 -1.442695, %v2408_v56 }
0x1905   :  { %v2420_v45 = vpop.permute.xlu0 %2419 }
0x1906   :  { %v2422_v60 = vadd.f32 %v2420_v45, %v2416_v7 }
0x1908   :  { %3326 = vtanh.f32 %v2422_v60 }
0x1909   :  { %3328 = vpow2.f32 %v2855_v53 }
0x1912   :  { %v3327_v6 = vpop.eup %3326 }
0x1913   :  { %2425 = vrot.lane.b32.xlu0 %v3327_v6, %s3520_s3  ;;  %v3329_v41 = vpop.eup %3328 }
0x1914   :  { %v2413_v54 = vadd.f32 1.0, %v3329_v41 }
0x1916   :  { %3330 = vrcp.f32 %v2413_v54 }
0x1920   :  { %v3331_v50 = vpop.eup %3330 }
0x1985   :  { %v2426_v44 = vpop.permute.xlu0 %2425 }
0x1986   :  { %v2428_v57 = vmul.f32 %v3331_v50, %v2426_v44 }
0x1988   :  { %2856 = vmatmul.mubr.msk.f32.vlgmr.msra.gmra.mrb[20].mxu1 %vm467_vm2, %v2428_v57 }
0x1989   :  { %3148 = vmatpush1.bf16.msra.mxu1 %v3862_v47  ;;  %2734 = vmatprep.mubr.f32.mxu1 %v3518_v0 }
0x198a   :  { %3150 = vmatprep.subr.bf16.mxu1 %v3864_v2 }
0x198d   :  { %3152 = vmatpush1.bf16.msra.mxu1 %v3869_v13 }
0x198e   :  { %3154 = vmatprep.subr.bf16.mxu1 %v3873_v14 }
0x1991   :  { %3156 = vmatpush1.bf16.msra.mxu1 %v3881_v19 }
0x1992   :  { %3158 = vmatprep.subr.bf16.mxu1 %v3883_v23 }
0x1995   :  { %3160 = vmatpush1.bf16.msra.mxu1 %v3886_v25 }
0x1a5b   :  { %v2498_v28 = vpop.f32.mrb[20].mxu1 }
0x1a5c   :  { %v2500_v55 = vpop.f32.mrb[21].mxu1 }
0x1a5d   :  { %v2505_v61 = vcombine.low %v2498_v28, %v2500_v55 }
0x1a5f   :  { %v2512_v58 = vrot.slane %v2505_v61, %v3632_v18 }
0x1a61   :  { %v2514_v47 = vadd.f32 %v2512_v58, %v3938_v35 }
0x1a63   :  { %2525 = vrot.lane.b32.xlu0 %v2514_v47, %s3520_s3  ;;  %v2857_v0 = vmul.f32 -1.442695, %v2514_v47  ;;  %v2522_v2 = vrot.slane %v2514_v47, 2 }
0x1a65   :  { %3332 = vpow2.f32 %v2857_v0 }
0x1a66   :  { %3334 = vtanh.f32 %v2522_v2 }
0x1a6f   :  { %v3333_v13 = vpop.eup %3332 }
0x1a70   :  { %v2518_v14 = vadd.f32 1.0, %v3333_v13  ;;  %v3335_v19 = vpop.eup %3334 }
0x1a72   :  { %3336 = vrcp.f32 %v2518_v14 }
0x1a7c   :  { %v3337_v23 = vpop.eup %3336 }
0x1a7d   :  { %v2536_v5 = vmul.f32 %v3337_v23, %v3335_v19  ;;  %v2535_v25 = vmul.f32 %v3337_v23, %v2422_v60 }
0x1a7f   :  { %2538 = vrot.lane.b32.xlu1 %v2536_v5, %s3520_s3 }
0x1ad5   :  { %v2526_v35 = vpop.permute.xlu0 %2525 }
0x1ad6   :  { %v2527_v1 = vrot.slane %v2526_v35, 2 }
0x1ad8   :  { %v2858_v8 = vmul.f32 -1.442695, %v2527_v1 }
0x1af1   :  { %v2539_v62 = vpop.permute.xlu1 %2538 }
0x1af2   :  { %v2541_v11 = vadd.f32 %v2539_v62, %v2535_v25 }
0x1af4   :  { %3338 = vtanh.f32 %v2541_v11 }
0x1af5   :  { %3340 = vpow2.f32 %v2858_v8 }
0x1afe   :  { %v3339_v63 = vpop.eup %3338 }
0x1aff   :  { %2544 = vrot.lane.b32.xlu1 %v3339_v63, %s3520_s3  ;;  %v3341_v9 = vpop.eup %3340 }
0x1b00   :  { %v2532_v12 = vadd.f32 1.0, %v3341_v9 }
0x1b02   :  { %3342 = vrcp.f32 %v2532_v12 }
0x1b0c   :  { %v3343_v52 = vpop.eup %3342 }
0x1b71   :  { %v2545_v15 = vpop.permute.xlu1 %2544 }
0x1b72   :  { %v2547_v16 = vmul.f32 %v3343_v52, %v2545_v15 }
0x1b74   :  { %2859 = vmatmul.mubr.msk.f32.vlgmr.msra.gmra.mrb[22].mxu0 %vm467_vm2, %v2547_v16 }
0x1c47   :  { %v2617_v59 = vpop.f32.mrb[22].mxu0 }
0x1c48   :  { %v2619_v17 = vpop.f32.mrb[23].mxu0 }
0x1c49   :  { %v2624_v20 = vcombine.low %v2617_v59, %v2619_v17 }
0x1c4b   :  { %v2631_v21 = vrot.slane %v2624_v20, %v3632_v18 }
0x1c4d   :  { %v2633_v38 = vadd.f32 %v2631_v21, %v3940_v36 }
0x1c4f   :  { %2644 = vrot.lane.b32.xlu1 %v2633_v38, %s3520_s3  ;;  %v2860_v22 = vmul.f32 -1.442695, %v2633_v38  ;;  %v2641_v24 = vrot.slane %v2633_v38, 2 }
0x1c51   :  { %3344 = vpow2.f32 %v2860_v22 }
0x1c52   :  { %3346 = vtanh.f32 %v2641_v24 }
0x1c5b   :  { %v3345_v26 = vpop.eup %3344 }
0x1c5c   :  { %v2637_v27 = vadd.f32 1.0, %v3345_v26  ;;  %v3347_v29 = vpop.eup %3346 }
0x1c5e   :  { %3348 = vrcp.f32 %v2637_v27 }
0x1c68   :  { %v3349_v30 = vpop.eup %3348 }
0x1c69   :  { %v2655_v31 = vmul.f32 %v3349_v30, %v3347_v29  ;;  %v2654_v3 = vmul.f32 %v3349_v30, %v2541_v11 }
0x1c6b   :  { %2657 = vrot.lane.b32.xlu0 %v2655_v31, %s3520_s3 }
0x1cc1   :  { %v2645_v36 = vpop.permute.xlu1 %2644 }
0x1cc2   :  { %v2646_v40 = vrot.slane %v2645_v36, 2 }
0x1cc4   :  { %v2861_v46 = vmul.f32 -1.442695, %v2646_v40 }
0x1cdd   :  { %v2658_v10 = vpop.permute.xlu0 %2657 }
0x1cde   :  { %v2660_v33 = vadd.f32 %v2658_v10, %v2654_v3 }
0x1ce0   :  { %3350 = vtanh.f32 %v2660_v33 }
0x1ce1   :  { %3352 = vpow2.f32 %v2861_v46 }
0x1cea   :  { %v3351_v39 = vpop.eup %3350 }
0x1ceb   :  { %2663 = vrot.lane.b32.xlu0 %v3351_v39, %s3520_s3  ;;  %v3353_v48 = vpop.eup %3352 }
0x1cec   :  { %v2651_v4 = vadd.f32 1.0, %v3353_v48 }
0x1cee   :  { %3354 = vrcp.f32 %v2651_v4 }
0x1cf8   :  { %v3355_v49 = vpop.eup %3354 }
0x1d5d   :  { %v2664_v43 = vpop.permute.xlu0 %2663 }
0x1d5e   :  { %v2666_v51 = vmul.f32 %v3355_v49, %v2664_v43 }
0x1d60   :  { %2862 = vmatmul.mubr.msk.f32.vlgmr.msra.gmra.mrb[22].mxu1 %vm467_vm2, %v2666_v51 }
0x1e33   :  { %v2736_v37 = vpop.f32.mrb[22].mxu1 }
0x1e34   :  { %v2738_v7 = vpop.f32.mrb[23].mxu1 }
0x1e35   :  { %v2743_v45 = vcombine.low %v2736_v37, %v2738_v7 }
0x1e37   :  { %v2750_v60 = vrot.slane %v2743_v45, %v3632_v18 }
0x1e39   :  { %v2752_v6 = vadd.f32 %v2750_v60, %v3944_v42 }
0x1e3b   :  { %2763 = vrot.lane.b32.xlu0 %v2752_v6, %s3520_s3  ;;  %v2863_v34 = vmul.f32 -1.442695, %v2752_v6  ;;  %v2760_v56 = vrot.slane %v2752_v6, 2 }
0x1e3d   :  { %3356 = vpow2.f32 %v2863_v34 }
0x1e3e   :  { %3358 = vtanh.f32 %v2760_v56 }
0x1e3f   :  { %1438 = vrot.lane.b32.xlu0 %v3895_v32, %s3521_s6 }
0x1e47   :  { %v3357_v53 = vpop.eup %3356 }
0x1e48   :  { %v2756_v41 = vadd.f32 1.0, %v3357_v53  ;;  %v3359_v54 = vpop.eup %3358 }
0x1e4a   :  { %3360 = vrcp.f32 %v2756_v41 }
0x1e54   :  { %v3361_v50 = vpop.eup %3360 }
0x1e55   :  { %v2774_v44 = vmul.f32 %v3361_v50, %v3359_v54  ;;  %v2773_v18 = vmul.f32 %v3361_v50, %v2660_v33 }
0x1e57   :  { %2776 = vrot.lane.b32.xlu1 %v2774_v44, %s3520_s3 }
0x1ead   :  { %v2764_v55 = vpop.permute.xlu0 %2763 }
0x1eae   :  { %v2765_v61 = vrot.slane %v2764_v55, 2 }
0x1eb0   :  { %v2864_v58 = vmul.f32 -1.442695, %v2765_v61 }
0x1eb1   :  { %v1439_v19 = vpop.permute.xlu0 %1438 }
0x1eb2   :  { %v1441_v23 = vadd.f32 %v1439_v19, %v3895_v32 }
0x1ec9   :  { %v2777_v57 = vpop.permute.xlu1 %2776 }
0x1eca   :  { %v2779_v42 = vadd.f32 %v2777_v57, %v2773_v18 }
0x1ecc   :  { %3362 = vtanh.f32 %v2779_v42 }
0x1ecd   :  { %3364 = vpow2.f32 %v2864_v58 }
0x1ed6   :  { %v3363_v28 = vpop.eup %3362 }
0x1ed7   :  { %2782 = vrot.lane.b32.xlu1 %v3363_v28, %s3520_s3  ;;  %v3365_v47 = vpop.eup %3364 }
0x1ed8   :  { %v2770_v0 = vadd.f32 1.0, %v3365_v47 }
0x1eda   :  { %3366 = vrcp.f32 %v2770_v0 }
0x1ee4   :  { %v3367_v2 = vpop.eup %3366 }
0x1f49   :  { %v2783_v13 = vpop.permute.xlu1 %2782 }
0x1f4a   :  { %v2785_v14 = vmul.f32 %v3367_v2, %v2783_v13 }
0x1f4c   :  { %2788 = vrot.lane.b32.xlu1 %v2785_v14, %s3521_s6  ;;  %v2786_v5 = vadd.f32 %v2785_v14, %v1441_v23 }
0x1fbe   :  { %v2789_v25 = vpop.permute.xlu1 %2788 }
0x1fbf   :  { %v2791_v62 = vadd.f32 %v2789_v25, %v2786_v5 }
0x1fc1   :  { %2793 = vst.msk [vmem:[#allocation12] sm:$0x3] %vm2792_vm3, %v2791_v62 }
0x1fc2   :  { %3489 = shalt.err (!%p3486_p2)
}
0x1fc3   :  { %s3490_s24 = scalar_lea.hbm %s4056_s7, 32 }
0x1fc4   :  { %p3491_p3 = scmp.ne.s32.totalorder %s4056_s7, %s3490_s24  ;;  %p3494_p4 = scmp.lt.u32.totalorder %s3490_s24, %s4056_s7 }
0x1fc6   :  { %p3496_p5 = pnand %p3494_p4, %p3491_p3 }
0x1fc8   :  { %3499 = shalt.err (!%p3496_p5)
}
0x1fc9   :  { %2803 = dma.vmem_to_hbm [thread:$0]  %s2801_s20, 32, %s4056_s7, [#allocation5]  }
0x1fca   :  { %3506 = dma.done.wait [#allocation5], 32  }
0x1fcb   :  { %3507 = vsyncadd [#allocation5], 4294967264 }
0x1fcc   :  { %2807 = vsyncpa [#allocation4], 1 }
0x1fcd   :  { %2808 = vsyncpa [#allocation7], 1 }
0x1fce   :  { %2809 = vsyncpa [#allocation10], 1 }
0x1fcf   :  { %2810 = vsyncpa [#allocation5], 1 }

</bundles_post_ra>
